<compile_context>
chip_gen: v5e
topology: v5e:2x2
jax: 0.10.0
libtpu: 0.0.40
codegen_flags: <defaults>
</compile_context>

<pallas_src>
import functools

import jax
import jax.numpy as jnp
from jax.experimental import pallas as pl
from jax.experimental.pallas import tpu as pltpu


_RMS_EPS_SQ = 1e-24  # (F.normalize eps = 1e-12) ** 2


def _rms_inv(x_f32):
    """1 / max(||x||_col, eps) for a [C, N] tile (rsqrt on EUP, no divide)."""
    ss = jnp.sum(x_f32 * x_f32, axis=0, keepdims=True)          # [1, N]
    return jax.lax.rsqrt(jnp.maximum(ss, _RMS_EPS_SQ))


def _context_kernel(x_ref, wkv_ref, g1_ref,
                    kv_out_ref, m_out_ref, l_out_ref,
                    m_ref, l_ref, kv_ref, *, hidden):
    """Pass 1: per-(batch, split) online softmax of k over N and k.vT accumulation."""
    n = pl.program_id(2)

    @pl.when(n == 0)
    def _():
        m_ref[...] = jnp.full(m_ref.shape, -jnp.inf, dtype=m_ref.dtype)
        l_ref[...] = jnp.zeros_like(l_ref)
        kv_ref[...] = jnp.zeros_like(kv_ref)

    # RMSNorm over channels (f32 math; g1 already carries sqrt(C)).
    xf = x_ref[0].astype(jnp.float32)                            # [C, TN]
    xn = ((xf * _rms_inv(xf)) * g1_ref[0][:, None]).astype(jnp.bfloat16)

    # k, v projections for this tile: [2*hidden, C] @ [C, TN], f32 accumulation.
    kv = jnp.dot(wkv_ref[...], xn, preferred_element_type=jnp.float32)
    k = kv[:hidden]                                              # [hidden, TN]
    v = kv[hidden:]                                              # [hidden, TN]

    # Online softmax over the spatial axis for k.
    m_prev = m_ref[...]                                          # [hidden, 1]
    m_new = jnp.maximum(m_prev, jnp.max(k, axis=1, keepdims=True))
    alpha = jnp.exp(m_prev - m_new)                              # rescale old partials
    p = jnp.exp(k - m_new)                                       # [hidden, TN]

    l_ref[...] = alpha * l_ref[...] + jnp.sum(p, axis=1, keepdims=True)
    # kv_acc[r, c] += sum_n p[r, n] * v[c, n]  (hidden-wide so the MXU runs wide).
    kv_ref[...] = alpha * kv_ref[...] + jax.lax.dot_general(
        p.astype(jnp.bfloat16), v.astype(jnp.bfloat16),
        (((1,), (1,)), ((), ())), preferred_element_type=jnp.float32)
    m_ref[...] = m_new

    @pl.when(n == pl.num_programs(2) - 1)
    def _():
        kv_out_ref[0, 0] = kv_ref[...]
        m_out_ref[0, 0] = m_ref[...]
        l_out_ref[0, 0] = l_ref[...]


def _apply_kernel(weff_ref, x_ref, wq_ref, bout_ref, g1_ref, g2_ref, o_ref,
                  *, heads, dim_head, scale):
    """Pass 2: q softmax, fused (w_out @ context) apply, bias, RMSNorm, residual."""
    hidden = heads * dim_head
    tn = x_ref.shape[2]

    xf = x_ref[0].astype(jnp.float32)                            # [C, TN]
    xn = ((xf * _rms_inv(xf)) * g1_ref[0][:, None]).astype(jnp.bfloat16)

    # q projection for this tile: [hidden, C] @ [C, TN].
    q = jnp.dot(wq_ref[...], xn, preferred_element_type=jnp.float32)

    # softmax over dim_head within each head (per spatial column); `scale` is folded
    # into the (approx) reciprocal so only one full-tile multiply remains.
    qh = q.reshape(heads, dim_head, tn)
    qh = jnp.exp(qh - jnp.max(qh, axis=1, keepdims=True))
    denom = jnp.sum(qh, axis=1, keepdims=True)
    q_soft = (qh * (pl.reciprocal(denom, approx=True) * scale))
    q_soft = q_soft.reshape(hidden, tn).astype(jnp.bfloat16)

    # y[c, n] = sum_r W_eff[c, r] * q_soft[r, n]   (w_out already fused into W_eff).
    y = jnp.dot(weff_ref[0], q_soft, preferred_element_type=jnp.float32)
    y = y + bout_ref[0][:, None]
    y = (y * _rms_inv(y)) * g2_ref[0][:, None]                   # g2 carries sqrt(C)

    o_ref[0] = (y + xf).astype(o_ref.dtype)


def _pick_n_tile(n):
    """Largest lane-dense (multiple of 128) divisor of n, capped at 2048; else n."""
    if n % 128 != 0:
        # TODO(synk): pad N to a multiple of 128 + mask the softmax tail instead of
        # falling back to one full-extent block (fine for typical diffusion sizes).
        return n
    best = 128
    t = 256
    while t <= min(n, 2048):
        if n % t == 0:
            best = t
        t += 128
    return best


def _vmem_limit_bytes(c, hidden, n_tile, out_bytes):
    """Scoped-VMEM budget derived from the chosen tile (capped below v7x's 64 MiB)."""
    io = 2 * c * n_tile * 2 + 2 * c * n_tile * out_bytes          # double-buffered x / out
    temps = 8 * max(c, 2 * hidden) * n_tile * 4                   # f32 intermediates
    weights = 2 * (4 * hidden * c + 4 * c) * 4 + hidden * hidden * 8
    est = int(1.3 * (io + temps + weights)) + (2 << 20)
    return max(32 << 20, min(est, 56 << 20))


def linear_attention(x_nchw, w_qkv, w_out, b_out, g1, g2, *,
                     heads, dim_head, n_tile=None, n_splits=None, out_dtype=None):
    B, C, H, W = x_nchw.shape
    N = H * W
    hidden = heads * dim_head
    scale = dim_head ** (-0.5)
    out_dtype = x_nchw.dtype if out_dtype is None else out_dtype

    if n_tile is None:
        n_tile = _pick_n_tile(N)
    assert N % n_tile == 0 and (n_tile % 128 == 0 or n_tile == N)
    nt_total = N // n_tile
    if n_splits is None:
        n_splits = 2 if (nt_total >= 2 and nt_total % 2 == 0) else 1
    assert nt_total % n_splits == 0
    nt_s = nt_total // n_splits

    vmem_limit = _vmem_limit_bytes(C, hidden, n_tile, jnp.dtype(out_dtype).itemsize)

    # bf16 HBM residency for x (read twice); f32 scalars/gains; bf16 matmul weights.
    x = x_nchw.reshape(B, C, N).astype(jnp.bfloat16)
    w_q = w_qkv[:hidden].astype(jnp.bfloat16)                    # [hidden, C]
    w_kv = w_qkv[hidden:].astype(jnp.bfloat16)                   # [2*hidden, C] (k rows, v rows)
    b_o = b_out.reshape(1, C).astype(jnp.float32)
    sqrt_c = float(C) ** 0.5
    g1_s = (g1.reshape(1, C) * sqrt_c).astype(jnp.float32)       # sqrt(C) folded into gain
    g2_s = (g2.reshape(1, C) * sqrt_c).astype(jnp.float32)

    # ---- pass 1: partial (kv, m, l) per (batch, split) ----
    ctx_kernel = functools.partial(_context_kernel, hidden=hidden)
    kv_parts, m_parts, l_parts = pl.pallas_call(
        ctx_kernel,
        out_shape=(
            jax.ShapeDtypeStruct((B, n_splits, hidden, hidden), jnp.float32),
            jax.ShapeDtypeStruct((B, n_splits, hidden, 1), jnp.float32),
            jax.ShapeDtypeStruct((B, n_splits, hidden, 1), jnp.float32),
        ),
        grid_spec=pltpu.PrefetchScalarGridSpec(
            num_scalar_prefetch=0,
            grid=(B, n_splits, nt_s),
            in_specs=[
                pl.BlockSpec((1, C, n_tile), lambda b, s, n: (b, 0, s * nt_s + n)),  # x tile
                pl.BlockSpec((2 * hidden, C), lambda b, s, n: (0, 0)),               # w_kv
                pl.BlockSpec((1, C), lambda b, s, n: (0, 0)),                        # g1
            ],
            out_specs=[
                pl.BlockSpec((1, 1, hidden, hidden), lambda b, s, n: (b, s, 0, 0)),
                pl.BlockSpec((1, 1, hidden, 1), lambda b, s, n: (b, s, 0, 0)),
                pl.BlockSpec((1, 1, hidden, 1), lambda b, s, n: (b, s, 0, 0)),
            ],
            scratch_shapes=[
                pltpu.VMEM((hidden, 1), jnp.float32),        # running max  m
                pltpu.VMEM((hidden, 1), jnp.float32),        # running sum  l
                pltpu.VMEM((hidden, hidden), jnp.float32),   # kv accumulator
            ],
        ),
        compiler_params=pltpu.CompilerParams(
            dimension_semantics=("parallel", "parallel", "arbitrary"),
            vmem_limit_bytes=vmem_limit),
    )(x, w_kv, g1_s)

    # ---- tiny wrapper epilogue: combine splits, normalize, mask, fuse w_out ----
    m_glob = jnp.max(m_parts, axis=1, keepdims=True)             # [B,1,hidden,1]
    rescale = jnp.exp(m_parts - m_glob)                          # [B,S,hidden,1]
    l_glob = jnp.sum(rescale * l_parts, axis=1)                  # [B,hidden,1]
    kv_glob = jnp.sum(rescale * kv_parts, axis=1)                # [B,hidden,hidden]
    ctx = kv_glob * (1.0 / l_glob)                               # normalize per (h,d) row
    head_r = jnp.arange(hidden) // dim_head
    mask = head_r[:, None] == head_r[None, :]
    ctx = jnp.where(mask[None], ctx, 0.0)                        # block-diagonal
    # W_eff[c, r] = sum_e w_out[c, e] * ctx[r, e]   (fuses to_out conv into the context)
    w_eff = jnp.einsum('ce,bre->bcr', w_out.astype(jnp.float32), ctx,
                       preferred_element_type=jnp.float32).astype(jnp.bfloat16)

    # ---- pass 2: apply context per N tile (fully parallel grid) ----
    apply_kernel = functools.partial(_apply_kernel, heads=heads,
                                     dim_head=dim_head, scale=scale)
    out = pl.pallas_call(
        apply_kernel,
        out_shape=jax.ShapeDtypeStruct((B, C, N), out_dtype),
        grid_spec=pltpu.PrefetchScalarGridSpec(
            num_scalar_prefetch=0,
            grid=(B, nt_total),
            in_specs=[
                pl.BlockSpec((1, C, hidden), lambda b, n: (b, 0, 0)),    # W_eff (bf16)
                pl.BlockSpec((1, C, n_tile), lambda b, n: (b, 0, n)),    # x tile (bf16)
                pl.BlockSpec((hidden, C), lambda b, n: (0, 0)),          # w_q
                pl.BlockSpec((1, C), lambda b, n: (0, 0)),               # b_out
                pl.BlockSpec((1, C), lambda b, n: (0, 0)),               # g1 * sqrt(C)
                pl.BlockSpec((1, C), lambda b, n: (0, 0)),               # g2 * sqrt(C)
            ],
            out_specs=pl.BlockSpec((1, C, n_tile), lambda b, n: (b, 0, n)),
        ),
        compiler_params=pltpu.CompilerParams(
            dimension_semantics=("parallel", "parallel"),
            vmem_limit_bytes=vmem_limit),
    )(w_eff, x, w_q, b_o, g1_s, g2_s)

    return out.reshape(B, C, H, W)


def linear_attention_ref(x_nchw, w_qkv, w_out, b_out, g1, g2, *,
                         heads, dim_head, operand_dtype=jnp.float32):
    """Pure-JAX reference.  operand_dtype=bfloat16 mirrors the kernel's mixed precision
    (bf16 x residency + bf16 matmul operands, f32 accumulation); float32 is the exact
    PyTorch-module semantics."""
    B, C, H, W = x_nchw.shape
    N = H * W
    hidden = heads * dim_head
    scale = dim_head ** (-0.5)
    xf = x_nchw.reshape(B, C, N).astype(operand_dtype).astype(jnp.float32)

    def rms(t, g):
        ss = jnp.sum(t * t, axis=1, keepdims=True)
        inv = jax.lax.rsqrt(jnp.maximum(ss, _RMS_EPS_SQ))
        return t * inv * (C ** 0.5) * g.reshape(1, C, 1)

    def cast(t):
        return t.astype(operand_dtype)

    xn = rms(xf, g1)
    qkv = jnp.einsum('oc,bcn->bon', cast(w_qkv), cast(xn),
                     preferred_element_type=jnp.float32)
    q, k, v = jnp.split(qkv, 3, axis=1)
    q = q.reshape(B, heads, dim_head, N)
    k = k.reshape(B, heads, dim_head, N)
    v = v.reshape(B, heads, dim_head, N)
    q = jax.nn.softmax(q, axis=2) * scale
    k = jax.nn.softmax(k, axis=3)
    ctx = jnp.einsum('bhdn,bhen->bhde', cast(k), cast(v),
                     preferred_element_type=jnp.float32)
    out = jnp.einsum('bhde,bhdn->bhen', cast(ctx), cast(q),
                     preferred_element_type=jnp.float32).reshape(B, hidden, N)
    y = jnp.einsum('oc,bcn->bon', cast(w_out), cast(out),
                   preferred_element_type=jnp.float32) + b_out.reshape(1, C, 1)
    y = rms(y, g2)
    return (y + xf).reshape(B, C, H, W)


def _check(x, w_qkv, w_out, b_out, g1, g2, *, heads, dim_head, n_tile):
    y = linear_attention(x, w_qkv, w_out, b_out, g1, g2,
                         heads=heads, dim_head=dim_head, n_tile=n_tile)
    y = jax.block_until_ready(y)
    assert y.shape == x.shape
    assert bool(jnp.all(jnp.isfinite(y)))

    # Mirror reference (bf16 residency + bf16 matmul operands) — tight-ish check.
    y_mirror = linear_attention_ref(x, w_qkv, w_out, b_out, g1, g2,
                                    heads=heads, dim_head=dim_head,
                                    operand_dtype=jnp.bfloat16)
    assert jnp.allclose(y, y_mirror, atol=2e-2, rtol=2e-2), \
        "mismatch vs bf16-mirror JAX reference"

    # Exact f32 module semantics — looser (covers bf16 / approx-reciprocal drift).
    y_f32 = linear_attention_ref(x, w_qkv, w_out, b_out, g1, g2,
                                 heads=heads, dim_head=dim_head,
                                 operand_dtype=jnp.float32)
    assert jnp.allclose(y, y_f32, atol=5e-2, rtol=5e-2), \
        "mismatch vs f32 JAX reference"


if __name__ == "__main__":
    # Small, deterministic configuration (dim=4, heads=4, dim_head=32 as in the module).
    B, dim, H, W = 2, 4, 16, 16
    heads, dim_head = 4, 32
    hidden = heads * dim_head

    key = jax.random.PRNGKey(0)
    kx, kx2, kqkv, kwo, kbo = jax.random.split(key, 5)

    x = jax.random.normal(kx, (B, dim, H, W), dtype=jnp.float32)
    w_qkv = 0.05 * jax.random.normal(kqkv, (3 * hidden, dim), dtype=jnp.float32)
    w_out = 0.05 * jax.random.normal(kwo, (dim, hidden), dtype=jnp.float32)
    b_out = 0.01 * jax.random.normal(kbo, (dim,), dtype=jnp.float32)
    g1 = jnp.ones((dim,), dtype=jnp.float32)   # RMSNorm gain (init = 1)
    g2 = jnp.ones((dim,), dtype=jnp.float32)   # RMSNorm gain inside to_out (init = 1)

    # N=256, n_tile=128 -> 2 tiles -> 2 reduction splits (combine path exercised).
    _check(x, w_qkv, w_out, b_out, g1, g2,
           heads=heads, dim_head=dim_head, n_tile=128)

    # B=1, N=512, n_tile=128 -> 2 splits x 2 tiles: exercises the in-kernel
    # online-softmax reduction AND the cross-split combine, with an odd batch.
    x2 = jax.random.normal(kx2, (1, dim, 16, 32), dtype=jnp.float32)
    _check(x2, w_qkv, w_out, b_out, g1, g2,
           heads=heads, dim_head=dim_head, n_tile=128)

    print("KERNEL_OK")
</pallas_src>

<mosaic_0001>
module attributes {stable_mosaic.version = 11 : i64} {
  func.func @_context_kernel(%arg0: i32, %arg1: i32, %arg2: i32, %arg3: memref<1x4x128xbf16, #tpu.memory_space<vmem>>, %arg4: memref<256x4xbf16, #tpu.memory_space<vmem>>, %arg5: memref<1x4xf32, #tpu.memory_space<vmem>>, %arg6: memref<1x1x128x128xf32, #tpu.memory_space<vmem>>, %arg7: memref<1x1x128x1xf32, #tpu.memory_space<vmem>>, %arg8: memref<1x1x128x1xf32, #tpu.memory_space<vmem>>, %arg9: memref<128x1xf32, #tpu.memory_space<vmem>>, %arg10: memref<128x1xf32, #tpu.memory_space<vmem>>, %arg11: memref<128x128xf32, #tpu.memory_space<vmem>>) attributes {dimension_semantics = [#tpu.dimension_semantics<parallel>, #tpu.dimension_semantics<parallel>, #tpu.dimension_semantics<arbitrary>], iteration_bounds = array<i64: 2, 2, 1>, scalar_prefetch = 0 : i64, scratch_operands = 3 : i64, tpu.core_type = #tpu.core_type<tc>, window_params = [{transform_indices = @transform_0, window_bounds = array<i64: 1, 4, 128>}, {pipeline_mode = #tpu.pipeline_mode<synchronous>, transform_indices = @transform_1, window_bounds = array<i64: 256, 4>}, {pipeline_mode = #tpu.pipeline_mode<synchronous>, transform_indices = @transform_2, window_bounds = array<i64: 1, 4>}, {transform_indices = @transform_3, window_bounds = array<i64: 1, 1, 128, 128>}, {transform_indices = @transform_4, window_bounds = array<i64: 1, 1, 128, 1>}, {transform_indices = @transform_5, window_bounds = array<i64: 1, 1, 128, 1>}]} {
    %c0_i32 = arith.constant 0 : i32
    %0 = arith.cmpi eq, %arg2, %c0_i32 : i32
    %1 = arith.extui %0 : i1 to i32
    %c0_i32_0 = arith.constant 0 : i32
    %2 = arith.cmpi ne, %1, %c0_i32_0 : i32
    scf.if %2 {
      %cst_26 = arith.constant 0xFF800000 : f32
      %51 = vector.broadcast %cst_26 : f32 to vector<128x1xf32>
      %c0_27 = arith.constant 0 : index
      %c0_28 = arith.constant 0 : index
      %52 = vector.load %arg9[%c0_27, %c0_28] : memref<128x1xf32, #tpu.memory_space<vmem>>, vector<128x1xf32>
      tpu.vector_store %arg9[%c0_27, %c0_28], %51 {strides = array<i32>} : memref<128x1xf32, #tpu.memory_space<vmem>>, vector<128x1xf32>,
      %cst_29 = arith.constant 0.000000e+00 : f32
      %53 = vector.broadcast %cst_29 : f32 to vector<128x1xf32>
      %c0_30 = arith.constant 0 : index
      %c0_31 = arith.constant 0 : index
      %54 = vector.load %arg10[%c0_30, %c0_31] : memref<128x1xf32, #tpu.memory_space<vmem>>, vector<128x1xf32>
      tpu.vector_store %arg10[%c0_30, %c0_31], %53 {strides = array<i32>} : memref<128x1xf32, #tpu.memory_space<vmem>>, vector<128x1xf32>,
      %cst_32 = arith.constant 0.000000e+00 : f32
      %55 = vector.broadcast %cst_32 : f32 to vector<128x128xf32>
      %c0_33 = arith.constant 0 : index
      %c0_34 = arith.constant 0 : index
      %56 = vector.load %arg11[%c0_33, %c0_34] : memref<128x128xf32, #tpu.memory_space<vmem>>, vector<128x128xf32>
      tpu.vector_store %arg11[%c0_33, %c0_34], %55 {strides = array<i32>} : memref<128x128xf32, #tpu.memory_space<vmem>>, vector<128x128xf32>,
    } else {
    }
    %c0 = arith.constant 0 : index
    %c0_1 = arith.constant 0 : index
    %c0_2 = arith.constant 0 : index
    %3 = vector.load %arg3[%c0, %c0_1, %c0_2] : memref<1x4x128xbf16, #tpu.memory_space<vmem>>, vector<1x4x128xbf16>
    %4 = vector.shape_cast %3 : vector<1x4x128xbf16> to vector<4x128xbf16>
    %5 = arith.extf %4 : vector<4x128xbf16> to vector<4x128xf32>
    %6 = arith.mulf %5, %5 : vector<4x128xf32>
    %cst = arith.constant dense<0.000000e+00> : vector<128xf32>
    %7 = vector.multi_reduction <add>, %6, %cst [0] : vector<4x128xf32> to vector<128xf32>
    %8 = vector.shape_cast %7 : vector<128xf32> to vector<1x128xf32>
    %cst_3 = arith.constant 1.000000e-24 : f32
    %9 = vector.broadcast %cst_3 : f32 to vector<1x128xf32>
    %10 = arith.maximumf %8, %9 : vector<1x128xf32>
    %11 = math.rsqrt %10 : vector<1x128xf32>
    %12 = vector.broadcast %11 : vector<1x128xf32> to vector<4x128xf32>
    %13 = arith.mulf %5, %12 : vector<4x128xf32>
    %c0_4 = arith.constant 0 : index
    %c0_5 = arith.constant 0 : index
    %14 = vector.load %arg5[%c0_4, %c0_5] : memref<1x4xf32, #tpu.memory_space<vmem>>, vector<1x4xf32>
    %15 = vector.shape_cast %14 : vector<1x4xf32> to vector<4xf32>
    %16 = vector.shape_cast %15 : vector<4xf32> to vector<4x1xf32>
    %17 = vector.broadcast %16 : vector<4x1xf32> to vector<4x128xf32>
    %18 = arith.mulf %13, %17 : vector<4x128xf32>
    %19 = arith.truncf %18 : vector<4x128xf32> to vector<4x128xbf16>
    %c0_6 = arith.constant 0 : index
    %c0_7 = arith.constant 0 : index
    %20 = vector.load %arg4[%c0_6, %c0_7] : memref<256x4xbf16, #tpu.memory_space<vmem>>, vector<256x4xbf16>
    %cst_8 = arith.constant dense<0.000000e+00> : vector<256x128xf32>
    %21 = tpu.matmul %20, %19, %cst_8 {dimension_numbers = #tpu.dot_dimension_numbers<[1], [0], [0], [1], [0, 0, 1, 1], [], []>} : vector<256x4xbf16>, vector<4x128xbf16>, vector<256x128xf32> -> vector<256x128xf32>
    %22 = vector.extract_strided_slice %21 {offsets = [0, 0], sizes = [128, 128], strides = [1, 1]} : vector<256x128xf32> to vector<128x128xf32>
    %23 = vector.extract_strided_slice %21 {offsets = [128, 0], sizes = [128, 128], strides = [1, 1]} : vector<256x128xf32> to vector<128x128xf32>
    %c0_9 = arith.constant 0 : index
    %c0_10 = arith.constant 0 : index
    %24 = vector.load %arg9[%c0_9, %c0_10] : memref<128x1xf32, #tpu.memory_space<vmem>>, vector<128x1xf32>
    %cst_11 = arith.constant dense<0xFF800000> : vector<128xf32>
    %25 = vector.multi_reduction <maximumf>, %22, %cst_11 [1] : vector<128x128xf32> to vector<128xf32>
    %26 = vector.shape_cast %25 : vector<128xf32> to vector<128x1xf32>
    %27 = arith.maximumf %24, %26 : vector<128x1xf32>
    %28 = arith.subf %24, %27 : vector<128x1xf32>
    %29 = math.exp %28 : vector<128x1xf32>
    %30 = vector.broadcast %27 : vector<128x1xf32> to vector<128x128xf32>
    %31 = arith.subf %22, %30 : vector<128x128xf32>
    %32 = math.exp %31 : vector<128x128xf32>
    %c0_12 = arith.constant 0 : index
    %c0_13 = arith.constant 0 : index
    %33 = vector.load %arg10[%c0_12, %c0_13] : memref<128x1xf32, #tpu.memory_space<vmem>>, vector<128x1xf32>
    %34 = arith.mulf %29, %33 : vector<128x1xf32>
    %cst_14 = arith.constant dense<0.000000e+00> : vector<128xf32>
    %35 = vector.multi_reduction <add>, %32, %cst_14 [1] : vector<128x128xf32> to vector<128xf32>
    %36 = vector.shape_cast %35 : vector<128xf32> to vector<128x1xf32>
    %37 = arith.addf %34, %36 : vector<128x1xf32>
    %c0_15 = arith.constant 0 : index
    %c0_16 = arith.constant 0 : index
    %38 = vector.load %arg10[%c0_15, %c0_16] : memref<128x1xf32, #tpu.memory_space<vmem>>, vector<128x1xf32>
    tpu.vector_store %arg10[%c0_15, %c0_16], %37 {strides = array<i32>} : memref<128x1xf32, #tpu.memory_space<vmem>>, vector<128x1xf32>,
    %c0_17 = arith.constant 0 : index
    %c0_18 = arith.constant 0 : index
    %39 = vector.load %arg11[%c0_17, %c0_18] : memref<128x128xf32, #tpu.memory_space<vmem>>, vector<128x128xf32>
    %40 = vector.broadcast %29 : vector<128x1xf32> to vector<128x128xf32>
    %41 = arith.mulf %40, %39 : vector<128x128xf32>
    %42 = arith.truncf %32 : vector<128x128xf32> to vector<128x128xbf16>
    %43 = arith.truncf %23 : vector<128x128xf32> to vector<128x128xbf16>
    %cst_19 = arith.constant dense<0.000000e+00> : vector<128x128xf32>
    %44 = tpu.matmul %42, %43, %cst_19 {dimension_numbers = #tpu.dot_dimension_numbers<[1], [1], [0], [0], [0, 0, 1, 0], [], []>} : vector<128x128xbf16>, vector<128x128xbf16>, vector<128x128xf32> -> vector<128x128xf32>
    %45 = arith.addf %41, %44 : vector<128x128xf32>
    %c0_20 = arith.constant 0 : index
    %c0_21 = arith.constant 0 : index
    %46 = vector.load %arg11[%c0_20, %c0_21] : memref<128x128xf32, #tpu.memory_space<vmem>>, vector<128x128xf32>
    tpu.vector_store %arg11[%c0_20, %c0_21], %45 {strides = array<i32>} : memref<128x128xf32, #tpu.memory_space<vmem>>, vector<128x128xf32>,
    %c0_22 = arith.constant 0 : index
    %c0_23 = arith.constant 0 : index
    %47 = vector.load %arg9[%c0_22, %c0_23] : memref<128x1xf32, #tpu.memory_space<vmem>>, vector<128x1xf32>
    tpu.vector_store %arg9[%c0_22, %c0_23], %27 {strides = array<i32>} : memref<128x1xf32, #tpu.memory_space<vmem>>, vector<128x1xf32>,
    %c0_i32_24 = arith.constant 0 : i32
    %48 = arith.cmpi eq, %arg2, %c0_i32_24 : i32
    %49 = arith.extui %48 : i1 to i32
    %c0_i32_25 = arith.constant 0 : i32
    %50 = arith.cmpi ne, %49, %c0_i32_25 : i32
    scf.if %50 {
      %c0_26 = arith.constant 0 : index
      %c0_27 = arith.constant 0 : index
      %51 = vector.load %arg11[%c0_26, %c0_27] : memref<128x128xf32, #tpu.memory_space<vmem>>, vector<128x128xf32>
      %c0_28 = arith.constant 0 : index
      %c0_29 = arith.constant 0 : index
      %c0_30 = arith.constant 0 : index
      %c0_31 = arith.constant 0 : index
      %52 = vector.load %arg6[%c0_28, %c0_29, %c0_30, %c0_31] : memref<1x1x128x128xf32, #tpu.memory_space<vmem>>, vector<1x1x128x128xf32>
      %53 = vector.shape_cast %52 : vector<1x1x128x128xf32> to vector<128x128xf32>
      %54 = vector.shape_cast %51 : vector<128x128xf32> to vector<1x1x128x128xf32>
      tpu.vector_store %arg6[%c0_28, %c0_29, %c0_30, %c0_31], %54 {strides = array<i32>} : memref<1x1x128x128xf32, #tpu.memory_space<vmem>>, vector<1x1x128x128xf32>,
      %c0_32 = arith.constant 0 : index
      %c0_33 = arith.constant 0 : index
      %55 = vector.load %arg9[%c0_32, %c0_33] : memref<128x1xf32, #tpu.memory_space<vmem>>, vector<128x1xf32>
      %c0_34 = arith.constant 0 : index
      %c0_35 = arith.constant 0 : index
      %c0_36 = arith.constant 0 : index
      %c0_37 = arith.constant 0 : index
      %56 = vector.load %arg7[%c0_34, %c0_35, %c0_36, %c0_37] : memref<1x1x128x1xf32, #tpu.memory_space<vmem>>, vector<1x1x128x1xf32>
      %57 = vector.shape_cast %56 : vector<1x1x128x1xf32> to vector<128x1xf32>
      %58 = vector.shape_cast %55 : vector<128x1xf32> to vector<1x1x128x1xf32>
      tpu.vector_store %arg7[%c0_34, %c0_35, %c0_36, %c0_37], %58 {strides = array<i32>} : memref<1x1x128x1xf32, #tpu.memory_space<vmem>>, vector<1x1x128x1xf32>,
      %c0_38 = arith.constant 0 : index
      %c0_39 = arith.constant 0 : index
      %59 = vector.load %arg10[%c0_38, %c0_39] : memref<128x1xf32, #tpu.memory_space<vmem>>, vector<128x1xf32>
      %c0_40 = arith.constant 0 : index
      %c0_41 = arith.constant 0 : index
      %c0_42 = arith.constant 0 : index
      %c0_43 = arith.constant 0 : index
      %60 = vector.load %arg8[%c0_40, %c0_41, %c0_42, %c0_43] : memref<1x1x128x1xf32, #tpu.memory_space<vmem>>, vector<1x1x128x1xf32>
      %61 = vector.shape_cast %60 : vector<1x1x128x1xf32> to vector<128x1xf32>
      %62 = vector.shape_cast %59 : vector<128x1xf32> to vector<1x1x128x1xf32>
      tpu.vector_store %arg8[%c0_40, %c0_41, %c0_42, %c0_43], %62 {strides = array<i32>} : memref<1x1x128x1xf32, #tpu.memory_space<vmem>>, vector<1x1x128x1xf32>,
    } else {
    }
    return
  }
  func.func @transform_0(%arg0: i32, %arg1: i32, %arg2: i32) -> (i32, i32, i32) {
    %c1_i32 = arith.constant 1 : i32
    %0 = arith.muli %arg1, %c1_i32 : i32
    %1 = arith.addi %0, %arg2 : i32
    %c0_i32 = arith.constant 0 : i32
    %c0_i32_0 = arith.constant 0 : i32
    return %arg0, %c0_i32, %1 : i32, i32, i32
  }
  func.func @transform_1(%arg0: i32, %arg1: i32, %arg2: i32) -> (i32, i32) {
    %c0_i32 = arith.constant 0 : i32
    %c0_i32_0 = arith.constant 0 : i32
    %c0_i32_1 = arith.constant 0 : i32
    return %c0_i32, %c0_i32_0 : i32, i32
  }
  func.func @transform_2(%arg0: i32, %arg1: i32, %arg2: i32) -> (i32, i32) {
    %c0_i32 = arith.constant 0 : i32
    %c0_i32_0 = arith.constant 0 : i32
    %c0_i32_1 = arith.constant 0 : i32
    return %c0_i32, %c0_i32_0 : i32, i32
  }
  func.func @transform_3(%arg0: i32, %arg1: i32, %arg2: i32) -> (i32, i32, i32, i32) {
    %c0_i32 = arith.constant 0 : i32
    %c0_i32_0 = arith.constant 0 : i32
    %c0_i32_1 = arith.constant 0 : i32
    return %arg0, %arg1, %c0_i32, %c0_i32_0 : i32, i32, i32, i32
  }
  func.func @transform_4(%arg0: i32, %arg1: i32, %arg2: i32) -> (i32, i32, i32, i32) {
    %c0_i32 = arith.constant 0 : i32
    %c0_i32_0 = arith.constant 0 : i32
    %c0_i32_1 = arith.constant 0 : i32
    return %arg0, %arg1, %c0_i32, %c0_i32_0 : i32, i32, i32, i32
  }
  func.func @transform_5(%arg0: i32, %arg1: i32, %arg2: i32) -> (i32, i32, i32, i32) {
    %c0_i32 = arith.constant 0 : i32
    %c0_i32_0 = arith.constant 0 : i32
    %c0_i32_1 = arith.constant 0 : i32
    return %arg0, %arg1, %c0_i32, %c0_i32_0 : i32, i32, i32, i32
  }
}

</mosaic_0001>

<bundles_post_ra>
// kernel: tpu_custom_call.1
= control target key start
LH: loop header
LB: loop body
LE: loop exit
PB: predicated region body
PF: predicated region fallthrough
CT: control target
= control target key end

     0   :  { %11 = vsyncpa [#allocation6], 0  ;;  %s2613_s0 = inlined_call_operand.vmem [shape: bf16[2,4,256], index: 0, kind: input, shape index: {}]   ;;  %s2614_s1 = inlined_call_operand.vmem [shape: bf16[256,4], index: 1, kind: input, shape index: {}]   ;;  %s2615_s2 = inlined_call_operand.vmem [shape: f32[1,4], index: 2, kind: input, shape index: {}]   ;;  %s2616_s3 = inlined_call_operand.hbm [shape: f32[2,2,128,128], index: 3, kind: output, shape index: {0}]   ;;  %s2617_s4 = inlined_call_operand.vmem [shape: f32[2,2,128,1], index: 4, kind: output, shape index: {1}]   ;;  %s2618_s5 = inlined_call_operand.vmem [shape: f32[2,2,128,1], index: 5, kind: output, shape index: {2}]  }
   0x1   :  { %13 = vsyncpa [#allocation6 + $0x1], 0  ;;  %s1921_s18 = smov 0   ;;  %s1923_s19 = smov 0  }
   0x2   :  { %s1925_s20 = smov 0   ;;  %s1927_s21 = smov 0  }
   0x3   :  { %s1929_s22 = smov 0   ;;  %s1931_s23 = smov 0  }
   0x4   :  { %s1933_s24 = smov 0   ;;  %s1935_s25 = smov 0  }
   0x5 LB: > { %s1518_s26 = sadd.s32 4294967295, %s1884_s25   ;;  %s1519_s27 = sadd.s32 4294967294, %s1884_s25   ;;  %s1884_s25 = sphi %s1935_s25, %s19_s25   ;;  %s1880_s24 = sphi %s1933_s24, %s2630_s24   ;;  %s1876_s23 = sphi %s1931_s23, %s2629_s23   ;;  %s1872_s22 = sphi %s1929_s22, %s2628_s22   ;;  %s1868_s21 = sphi %s1927_s21, %s2627_s21   ;;  %s1864_s20 = sphi %s1925_s20, %s2626_s20   ;;  %s1860_s19 = sphi %s1923_s19, %s2625_s19   ;;  %s1856_s18 = sphi %s1921_s18, %s2624_s18  }
   0x6   : > { %s34_s28 = sadd.s32 1, %s1876_s23  ;;  %s38_s29 = sadd.s32 1, %s1880_s24 }
   0x7   : > { %p36_p0 = scmp.ge.s32.totalorder %s34_s28, 2  ;;  %p129_p1 = scmp.ne.s32.totalorder %s1864_s20, %s1860_s19 }
   0x8   : > { %p130_p2 = scmp.eq.s32.totalorder %s1518_s26, 3  ;;  %p135_p5 = scmp.ne.s32.totalorder %s1860_s19, %s1856_s18 }
   0x9   : > { %s2632_s28 = smov (%p36_p0, %s34_s28), 0  ;;  %s2634_s29 = smov (!%p36_p0, %s38_s29), %s1880_s24 }
   0xa   : > { %s115_s30 = ssub.s32 %s1876_s23, %s2632_s28  ;;  %p1972_p3 = por %p130_p2, %p129_p1 }
   0xb   : > { %p40_p4 = scmp.ge.s32.totalorder %s2634_s29, 2  ;;  %p136_p6 = scmp.eq.s32.totalorder %s1519_s27, 3 }
   0xc   : > { %p1522_p7 = scmp.ge.s32.totalorder %s1884_s25, 1  ;;  %p229_p9 = scmp.lt.s32.totalorder %s1884_s25, 5 }
   0xd   : > { %s2636_s29 = smov (%p40_p4, %s2634_s29), 0  ;;  %p1981_p8 = por %p136_p6, %p135_p5 }
   0xe   : > { %2621 = sst [smem:[#allocation8_spill]] %s2636_s29  ;;  %s114_s8 = ssub.s32 %s1880_s24, %s2636_s29 }
   0xf   : > { %s119_s9 = sadd.s32 1, %s1864_s20  ;;  %s116_s10 = sor.u32 %s115_s30, %s114_s8 }
  0x10   : > { %p230_p10 = pnand %p1522_p7, %p229_p9  ;;  %p117_p11 = scmp.eq.s32.totalorder %s116_s10, 0 }
  0x11   : > { %p280_p12 = scmp.lt.s32.totalorder (!%p230_p10), %s1872_s22, 1  ;;  %p282_p13 = scmp.lt.s32.totalorder (!%p230_p10), %s1868_s21, 1 }
  0x12   : > { %s1990_s11 = scalar_select %p117_p11, %s1864_s20, %s119_s9  }
  0x13   : > { %233 = sbr.rel (%p230_p10) target bundleno = 817 (0x331), region = 32  ;;  %s1614_s26 = sshll.u32 (!%p230_p10), %s1872_s22, 5 }
  0x18   : > { %v386_v0 = vlaneseq  ;;  %s281_s12 = scalar_select %p280_p12, %s1872_s22, 1  ;;  %v1723_v2 = vld [vmem:[%s2615_s2] ss:$0 sm:$0xff]  ;;  %vm364_vm0 = vcmask 1043456   ;;  %vm555_vm4 = vcmask 1041408   ;;  %v1625_v27 = vld [vmem:[%s2614_s1 + $0x38] sm:$0xff] }
  0x19   : > { %s283_s13 = scalar_select %p282_p13, %s1868_s21, 1  ;;  %v1618_v26 = vld [vmem:[%s2614_s1] sm:$0xff]  ;;  %vm506_vm5 = vcmask 31744   ;;  %v1619_v28 = vld [vmem:[%s2614_s1 + $0x8] sm:$0xff]  ;;  %v1620_v30 = vld [vmem:[%s2614_s1 + $0x10] sm:$0xff]  ;;  %vm312_vm6 = vcmask 7168  }
  0x1a   : > { %v387_v1 = vshrl.u32 %v386_v0, 7  ;;  %s1527_s14 = sshll.u32 %s281_s12, 5  ;;  %s1524_s27 = sshll.u32 %s281_s12, 1  ;;  %v1626_v29 = vld [vmem:[%s2614_s1 + $0x40] sm:$0xff]  ;;  %v1627_v31 = vld [vmem:[%s2614_s1 + $0x48] sm:$0xff]  ;;  %v1621_v32 = vld [vmem:[%s2614_s1 + $0x18] sm:$0xff] }
  0x1b   : > { %s1526_s15 = sshll.u32 %s283_s13, 4  ;;  %s285_s30 = sadd.s32 %s1524_s27, %s283_s13  ;;  %v1628_v33 = vld [vmem:[%s2614_s1 + $0x50] sm:$0xff]  ;;  %v1622_v34 = vld [vmem:[%s2614_s1 + $0x20] sm:$0xff]  ;;  %v1629_v35 = vld [vmem:[%s2614_s1 + $0x58] sm:$0xff]  ;;  %v1886_v0 = vmov -inf  }
  0x1c   : > { %1719 = vset.pattern.permute.xlu0 %v387_v1  ;;  %s1996_s16 = sadd.s32 %s1527_s14, %s1526_s15  ;;  %s1525_s8 = sshll.u32 %s285_s30, 1  ;;  %v1623_v36 = vld [vmem:[%s2614_s1 + $0x28] sm:$0xff]  ;;  %v1630_v37 = vld [vmem:[%s2614_s1 + $0x60] sm:$0xff]  ;;  %v1624_v38 = vld [vmem:[%s2614_s1 + $0x30] sm:$0xff]  ;;  %313 = vst.msk [vmem:[#allocation2] sm:$0xff] %vm312_vm6, %v1886_v0 }
  0x1d   : > { %s287_s29 = scalar_lea.vmem %s2613_s0, %s1525_s8  ;;  %v1631_v39 = vld [vmem:[%s2614_s1 + $0x68] sm:$0xff]  ;;  %v1632_v40 = vld [vmem:[%s2614_s1 + $0x70] sm:$0xff]  ;;  %v1633_v41 = vld [vmem:[%s2614_s1 + $0x78] sm:$0xff]  ;;  %314 = vst.msk [vmem:[#allocation2 + $0x8] sm:$0xff] %vm312_vm6, %v1886_v0  ;;  %s1528_s30 = sshll.u32 %s1996_s16, 3 }
  0x1e   : > { %v361_v3 = vld [vmem:[%s287_s29] sm:$0x3]  ;;  %315 = vst.msk [vmem:[#allocation2 + $0x10] sm:$0xff] %vm312_vm6, %v1886_v0  ;;  %s2184_s10 = scalar_lea.vmem %s2617_s4, %s1528_s30  ;;  %s254_s29 = sand.u32 1, %s1860_s19  }
  0x1f   : > { %v362_v4 = vunpack.c.l.bf16 %v361_v3  ;;  %316 = vst.msk [vmem:[#allocation2 + $0x18] sm:$0xff] %vm312_vm6, %v1886_v0  ;;  %s1523_s12 = sshll.u32 %s254_s29, 7  ;;  %s2486_s17 = scalar_lea.vmem %s2618_s5, %s1528_s30 }
  0x20   : > { %317 = vst.msk [vmem:[#allocation2 + $0x20] sm:$0xff] %vm312_vm6, %v1886_v0  ;;  %s2457_s13 = scalar_lea.vmem [#allocation5], %s1523_s12  ;;  %s1613_s16 = sshll.u32 %s1868_s21, 4 }
  0x21   : > { %v363_v5 = vmul.f32 %v362_v4, %v362_v4  ;;  %318 = vst.msk [vmem:[#allocation2 + $0x28] sm:$0xff] %vm312_vm6, %v1886_v0  ;;  %s1339_s27 = sadd.s32 %s1614_s26, %s1613_s16  ;;  %s1342_s12 = sshll.u32 %s2457_s13, 4  ;;  %s1343_s12 = int_to_ptr.vmem [resolvable:$true] %s1342_s12 }
  0x22   : > { %319 = vst.msk [vmem:[#allocation2 + $0x30] sm:$0xff] %vm312_vm6, %v1886_v0  ;;  %s1615_s30 = sshll.u32 %s1339_s27, 3  ;;  %s1310_s21 = scalar_lea.sflag [#allocation6], %s254_s29 }
  0x23   : > { %v365_v6 = vsel %vm364_vm0, %v363_v5, 0.0  ;;  %320 = vst.msk [vmem:[#allocation2 + $0x38] sm:$0xff] %vm312_vm6, %v1886_v0  ;;  %s1810_s26 = scalar_lea.hbm %s2616_s3, 512 }
  0x24   : > { %390 = vperm.xlu0 %1719, %v1723_v2   ;;  %v366_v7 = vrot.slane %v365_v6, 4  ;;  %321 = vst.msk [vmem:[#allocation2 + $0x40] sm:$0xff] %vm312_vm6, %v1886_v0 }
  0x25   : > { %322 = vst.msk [vmem:[#allocation2 + $0x48] sm:$0xff] %vm312_vm6, %v1886_v0 }
  0x26   : > { %v367_v8 = vadd.f32 %v366_v7, %v365_v6  ;;  %323 = vst.msk [vmem:[#allocation2 + $0x50] sm:$0xff] %vm312_vm6, %v1886_v0  ;;  %v1887_v6 = vmov 0.0  }
  0x27   : > { %324 = vst.msk [vmem:[#allocation2 + $0x58] sm:$0xff] %vm312_vm6, %v1886_v0 }
  0x28   : > { %v368_v9 = vrot.slane %v367_v8, 2  ;;  %325 = vst.msk [vmem:[#allocation2 + $0x60] sm:$0xff] %vm312_vm6, %v1886_v0 }
  0x29   : > { %326 = vst.msk [vmem:[#allocation2 + $0x68] sm:$0xff] %vm312_vm6, %v1886_v0 }
  0x2a   : > { %v369_v10 = vadd.f32 %v368_v9, %v367_v8  ;;  %327 = vst.msk [vmem:[#allocation2 + $0x70] sm:$0xff] %vm312_vm6, %v1886_v0  ;;  %v1888_v9 = vmov 0  }
  0x2b   : > { %328 = vst.msk [vmem:[#allocation2 + $0x78] sm:$0xff] %vm312_vm6, %v1886_v0  ;;  %1721 = vset.pattern.permute.xlu2 %v1888_v9  ;;  %1720 = vset.pattern.permute.xlu1 %v1888_v9 }
  0x2c   : > { %v370_v11 = vrot.slane %v369_v10, 1  ;;  %329 = vst.msk [vmem:[#allocation3] sm:$0xff] %vm312_vm6, %v1887_v6  ;;  %1722 = vset.pattern.permute.xlu0 %v1888_v9 }
  0x2d   : > { %330 = vst.msk [vmem:[#allocation3 + $0x8] sm:$0xff] %vm312_vm6, %v1887_v6 }
  0x2e   : > { %v371_v12 = vadd.f32 %v370_v11, %v369_v10  ;;  %331 = vst.msk [vmem:[#allocation3 + $0x10] sm:$0xff] %vm312_vm6, %v1887_v6 }
  0x2f   : > { %332 = vst.msk [vmem:[#allocation3 + $0x18] sm:$0xff] %vm312_vm6, %v1887_v6 }
  0x30   : > { %v372_v13 = vmax.f32 %v371_v12, 1e-24  ;;  %333 = vst.msk [vmem:[#allocation3 + $0x20] sm:$0xff] %vm312_vm6, %v1887_v6 }
  0x31   : > { %334 = vst.msk [vmem:[#allocation3 + $0x28] sm:$0xff] %vm312_vm6, %v1887_v6 }
  0x32   : > { %1724 = vrsqrt.f32 %v372_v13  ;;  %vm379_vm1 = vweird.f32 %v372_v13  ;;  %335 = vst.msk [vmem:[#allocation3 + $0x30] sm:$0xff] %vm312_vm6, %v1887_v6 }
  0x33   : > { %336 = vst.msk [vmem:[#allocation3 + $0x38] sm:$0xff] %vm312_vm6, %v1887_v6 }
  0x34   : > { %337 = vst.msk [vmem:[#allocation3 + $0x40] sm:$0xff] %vm312_vm6, %v1887_v6 }
  0x35   : > { %338 = vst.msk [vmem:[#allocation3 + $0x48] sm:$0xff] %vm312_vm6, %v1887_v6 }
  0x36   : > { %339 = vst.msk [vmem:[#allocation3 + $0x50] sm:$0xff] %vm312_vm6, %v1887_v6 }
  0x37   : > { %340 = vst.msk [vmem:[#allocation3 + $0x58] sm:$0xff] %vm312_vm6, %v1887_v6 }
  0x38   : > { %v1725_v14 = vpop.eup %1724  ;;  %341 = vst.msk [vmem:[#allocation3 + $0x60] sm:$0xff] %vm312_vm6, %v1887_v6 }
  0x39   : > { %v374_v15 = vmul.f32 %v1725_v14, %v372_v13  ;;  %vm380_vm2 = vweird.f32 %v1725_v14  ;;  %342 = vst.msk [vmem:[#allocation3 + $0x68] sm:$0xff] %vm312_vm6, %v1887_v6 }
  0x3a   : > { %vm381_vm3 = vmor %vm379_vm1, %vm380_vm2  ;;  %343 = vst.msk [vmem:[#allocation3 + $0x70] sm:$0xff] %vm312_vm6, %v1887_v6 }
  0x3b   : > { %v375_v16 = vmul.f32 %v1725_v14, %v374_v15  ;;  %344 = vst.msk [vmem:[#allocation3 + $0x78] sm:$0xff] %vm312_vm6, %v1887_v6 }
  0x3d   : > { %v376_v17 = vmul.f32 0.5, %v375_v16 }
  0x3f   : > { %v377_v18 = vsub.f32 1.5, %v376_v17 }
  0x41   : > { %v378_v19 = vmul.f32 %v1725_v14, %v377_v18 }
  0x43   : > { %v382_v20 = vsel %vm381_vm3, %v1725_v14, %v378_v19  ;;  %v2162_v14 = vld [vmem:[#allocation2] sm:$0xff]  ;;  %v2171_v19 = vld [vmem:[#allocation2 + $0x70] sm:$0xff] }
  0x44   : > { %v383_v21 = vmul.f32 %v382_v20, %v362_v4  ;;  %v2174_v20 = vld [vmem:[#allocation2 + $0x8] sm:$0xff] }
  0x96   : > { %v391_v22 = vpop.permute.xlu0 %390 }
  0x97   : > { %v392_v23 = vmul.f32 %v391_v22, %v383_v21 }
  0x99   : > { %v393_v24 = vpack.c.bf16 %v392_v23, %v392_v23 }
  0x9b   : > { %v557_v25 = vsel %vm555_vm4, %v393_v24, 0 }
  0x9c   : > { %566 = vmatpush.bf16.msra.mxu0 %v557_v25  ;;  %1634 = vmatpush.bf16.msra.mxu2 %v557_v25 }
  0x9f   : > { %1596 = vmatmul.msk.bf16.vlgmr.msra.gmra.mxu0 %vm506_vm5, %v1618_v26  ;;  %1603 = vmatmul.msk.bf16.vlgmr.msra.gmra.mxu2 %vm506_vm5, %v1625_v27 }
  0xaf   : > { %1597 = vmatmul.msk.bf16.gmra.mxu0 %vm506_vm5, %v1619_v28  ;;  %1604 = vmatmul.msk.bf16.gmra.mxu2 %vm506_vm5, %v1626_v29  ;;  %v2199_v28 = vld [vmem:[#allocation2 + $0x10] sm:$0xff] }
  0xbf   : > { %1598 = vmatmul.msk.bf16.gmra.mxu0 %vm506_vm5, %v1620_v30  ;;  %1605 = vmatmul.msk.bf16.gmra.mxu2 %vm506_vm5, %v1627_v31 }
  0xcf   : > { %1599 = vmatmul.msk.bf16.gmra.mxu0 %vm506_vm5, %v1621_v32  ;;  %1606 = vmatmul.msk.bf16.gmra.mxu2 %vm506_vm5, %v1628_v33 }
  0xdf   : > { %1600 = vmatmul.msk.bf16.gmra.mxu0 %vm506_vm5, %v1622_v34  ;;  %1607 = vmatmul.msk.bf16.gmra.mxu2 %vm506_vm5, %v1629_v35  ;;  %v2213_v35 = vld [vmem:[#allocation2 + $0x18] sm:$0xff] }
  0xef   : > { %1601 = vmatmul.msk.bf16.gmra.mxu0 %vm506_vm5, %v1623_v36  ;;  %1608 = vmatmul.msk.bf16.gmra.mxu2 %vm506_vm5, %v1630_v37 }
  0xff   : > { %1602 = vmatmul.msk.bf16.gmra.mxu0 %vm506_vm5, %v1624_v38  ;;  %1609 = vmatmul.msk.bf16.gmra.mxu2 %vm506_vm5, %v1631_v39 }
 0x10f   : > { %1610 = vmatmul.msk.bf16.gmra.mxu2 %vm506_vm5, %v1632_v40 }
 0x11c   : > { %v2067_v42 = vpop.f32.mrf.mxu0 }
 0x11d   : > { %664 = vmax.xlane.f32.xlu0 %v2067_v42 }
 0x11f   : > { %1611 = vmatmul.msk.bf16.gmra.mxu2 %vm506_vm5, %v1633_v41 }
 0x122   : > { %v2071_v43 = vpop.f32.mrf.mxu2 }
 0x123   : > { %692 = vmax.xlane.f32.xlu2 %v2071_v43 }
 0x124   : > { %v2074_v44 = vpop.f32.mrf.mxu0 }
 0x125   : > { %666 = vmax.xlane.f32.xlu1 %v2074_v44 }
 0x12a   : > { %v2077_v45 = vpop.f32.mrf.mxu2 }
 0x12b   : > { %694 = vmax.xlane.f32.xlu0 %v2077_v45 }
 0x12c   : > { %v2080_v46 = vpop.f32.mrf.mxu0 }
 0x12d   : > { %668 = vmax.xlane.f32.xlu1 %v2080_v46 }
 0x132   : > { %v608_v47 = vpop.f32.mrf.mxu2 }
 0x134   : > { %v2083_v48 = vpop.f32.mrf.mxu0 }
 0x135   : > { %670 = vmax.xlane.f32.xlu2 %v2083_v48 }
 0x13a   : > { %v610_v49 = vpop.f32.mrf.mxu2 }
 0x13b   : > { %v2086_v50 = vpack.c.bf16 %v610_v49, %v608_v47  ;;  %v2225_v47 = vld [vmem:[#allocation2 + $0x20] sm:$0xff] }
 0x13c   : > { %v2088_v51 = vpop.f32.mrf.mxu0 }
 0x13d   : > { %672 = vmax.xlane.f32.xlu2 %v2088_v51 }
 0x142   : > { %v613_v52 = vpop.f32.mrf.mxu2 }
 0x144   : > { %v2091_v53 = vpop.f32.mrf.mxu0 }
 0x145   : > { %674 = vmax.xlane.f32.xlu1 %v2091_v53 }
 0x14a   : > { %v615_v54 = vpop.f32.mrf.mxu2 }
 0x14b   : > { %v2094_v55 = vpack.c.bf16 %v615_v54, %v613_v52 }
 0x14c   : > { %v2096_v56 = vpop.f32.mrf.mxu0 }
 0x14d   : > { %676 = vmax.xlane.f32.xlu2 %v2096_v56 }
 0x152   : > { %v618_v57 = vpop.f32.mrf.mxu2 }
 0x154   : > { %v2099_v58 = vpop.f32.mrf.mxu0 }
 0x155   : > { %678 = vmax.xlane.f32.xlu1 %v2099_v58 }
 0x15a   : > { %v620_v59 = vpop.f32.mrf.mxu2 }
 0x15b   : > { %v2102_v60 = vpack.c.bf16 %v620_v59, %v618_v57 }
 0x15c   : > { %v2104_v61 = vpop.f32.mrf.mxu0 }
 0x15d   : > { %680 = vmax.xlane.f32.xlu2 %v2104_v61 }
 0x162   : > { %v623_v62 = vpop.f32.mrf.mxu2 }
 0x164   : > { %v2107_v63 = vpop.f32.mrf.mxu0 }
 0x165   : > { %682 = vmax.xlane.f32.xlu1 %v2107_v63 }
 0x16a   : > { %v625_v1 = vpop.f32.mrf.mxu2 }
 0x16b   : > { %v2112_v2 = vpack.c.bf16 %v625_v1, %v623_v62  ;;  %v2237_v62 = vld [vmem:[#allocation2 + $0x78] sm:$0xff] }
 0x16c   : > { %v2115_v3 = vpop.f32.mrf.mxu0 }
 0x16d   : > { %684 = vmax.xlane.f32.xlu2 %v2115_v3 }
 0x172   : > { %v628_v4 = vpop.f32.mrf.mxu2 }
 0x174   : > { %v2126_v5 = vpop.f32.mrf.mxu0 }
 0x175   : > { %686 = vmax.xlane.f32.xlu1 %v2126_v5 }
 0x17a   : > { %v630_v7 = vpop.f32.mrf.mxu2 }
 0x17b   : > { %v2136_v8 = vpack.c.bf16 %v630_v7, %v628_v4  ;;  %v2242_v4 = vld [vmem:[#allocation2 + $0x28] sm:$0xff] }
 0x17c   : > { %v2139_v10 = vpop.f32.mrf.mxu0 }
 0x17d   : > { %688 = vmax.xlane.f32.xlu2 %v2139_v10 }
 0x182   : > { %v2148_v11 = vpop.f32.mrf.mxu2 }
 0x184   : > { %v2152_v12 = vpop.f32.mrf.mxu0 }
 0x185   : > { %690 = vmax.xlane.f32.xlu1 %v2152_v12 }
 0x18a   : > { %v2160_v13 = vpop.f32.mrf.mxu2 }
 0x18b   : > { %v1110_v7 = vpack.c.bf16 %v2160_v13, %v2148_v11 }
 0x190   : > { %v665_v15 = vpop.xlane.xlu0 %664 }
 0x191   : > { %v2165_v16 = vmax.f32 %v2162_v14, %v665_v15 }
 0x192   : > { %v638_v17 = vpop.f32.mrf.mxu2 }
 0x193   : > { %v712_v18 = vsub.f32 %v2162_v14, %v2165_v16  ;;  %1194 = vst.msk [vmem:[#allocation2] sm:$0xff] %vm312_vm6, %v2165_v16 }
 0x196   : > { %v693_v21 = vpop.xlane.xlu2 %692 }
 0x197   : > { %v2177_v22 = vmax.f32 %v2171_v19, %v693_v21  ;;  %v2258_v21 = vld [vmem:[#allocation2 + $0x30] sm:$0xff] }
 0x198   : > { %v667_v23 = vpop.xlane.xlu1 %666 }
 0x199   : > { %v2187_v24 = vmax.f32 %v2174_v20, %v667_v23  ;;  %1208 = vst.msk [vmem:[#allocation2 + $0x70] sm:$0xff] %vm312_vm6, %v2177_v22 }
 0x19a   : > { %v1245_v25 = vld [vmem:[#allocation2] sm:$0xff]  ;;  %v640_v26 = vpop.f32.mrf.mxu2 }
 0x19b   : > { %1261 = vst.msk [vmem:[%s2184_s10] sm:$0xff] %vm312_vm6, %v1245_v25  ;;  %v713_v27 = vsub.f32 %v2174_v20, %v2187_v24  ;;  %767 = vperm.xlu2 %1721, %v2187_v24   ;;  %v1111_v52 = vpack.c.bf16 %v640_v26, %v638_v17  ;;  %v2271_v26 = vld [vmem:[#allocation2 + $0x38] sm:$0xff] }
 0x19c   : > { %1195 = vst.msk [vmem:[#allocation2 + $0x8] sm:$0xff] %vm312_vm6, %v2187_v24 }
 0x19e   : > { %762 = vperm.xlu1 %1720, %v2165_v16   ;;  %v695_v0 = vpop.xlane.xlu0 %694 }
 0x19f   : > { %v2240_v1 = vmax.f32 %v2237_v62, %v695_v0  ;;  %v2305_v0 = vld [vmem:[#allocation2 + $0x50] sm:$0xff] }
 0x1a0   : > { %v1259_v29 = vld [vmem:[#allocation2 + $0x70] sm:$0xff]  ;;  %v669_v30 = vpop.xlane.xlu1 %668 }
 0x1a1   : > { %1275 = vst.msk [vmem:[%s2184_s10 + $0x70] sm:$0xff] %vm312_vm6, %v1259_v29  ;;  %v2204_v31 = vmax.f32 %v2199_v28, %v669_v30 }
 0x1a2   : > { %v643_v32 = vpop.f32.mrf.mxu2  ;;  %1209 = vst.msk [vmem:[#allocation2 + $0x78] sm:$0xff] %vm312_vm6, %v2240_v1 }
 0x1a3   : > { %v1246_v33 = vld [vmem:[#allocation2 + $0x8] sm:$0xff]  ;;  %v714_v34 = vsub.f32 %v2199_v28, %v2204_v31  ;;  %1196 = vst.msk [vmem:[#allocation2 + $0x10] sm:$0xff] %vm312_vm6, %v2204_v31  ;;  %772 = vperm.xlu0 %1722, %v2204_v31   ;;  %v728_v31 = vmul.f32 1.442695, %v712_v18 }
 0x1a4   : > { %1262 = vst.msk [vmem:[%s2184_s10 + $0x8] sm:$0xff] %vm312_vm6, %v1246_v33 }
 0x1a8   : > { %v671_v36 = vpop.xlane.xlu2 %670 }
 0x1a9   : > { %v2216_v37 = vmax.f32 %v2213_v35, %v671_v36  ;;  %v1260_v11 = vld [vmem:[#allocation2 + $0x78] sm:$0xff] }
 0x1aa   : > { %v1247_v38 = vld [vmem:[#allocation2 + $0x10] sm:$0xff]  ;;  %v645_v39 = vpop.f32.mrf.mxu2  ;;  %1276 = vst.msk [vmem:[%s2184_s10 + $0x78] sm:$0xff] %vm312_vm6, %v1260_v11 }
 0x1ab   : > { %1263 = vst.msk [vmem:[%s2184_s10 + $0x10] sm:$0xff] %vm312_vm6, %v1247_v38  ;;  %v715_v40 = vsub.f32 %v2213_v35, %v2216_v37  ;;  %v1112_v41 = vpack.c.bf16 %v645_v39, %v643_v32  ;;  %777 = vperm.xlu2 %1721, %v2216_v37  }
 0x1ac   : > { %1197 = vst.msk [vmem:[#allocation2 + $0x18] sm:$0xff] %vm312_vm6, %v2216_v37 }
 0x1ad   : > { %1113 = vmatpush.bf16.xpose.msra.mxu1 %v1112_v41  ;;  %1635 = vmatpush.bf16.xpose.msra.mxu3 %v1112_v41  ;;  %v734_v20 = vmul.f32 1.442695, %v715_v40 }
 0x1b0   : > { %v673_v49 = vpop.xlane.xlu2 %672 }
 0x1b1   : > { %v2228_v54 = vmax.f32 %v2225_v47, %v673_v49 }
 0x1b3   : > { %v1248_v57 = vld [vmem:[#allocation2 + $0x18] sm:$0xff]  ;;  %v716_v59 = vsub.f32 %v2225_v47, %v2228_v54  ;;  %1198 = vst.msk [vmem:[#allocation2 + $0x20] sm:$0xff] %vm312_vm6, %v2228_v54  ;;  %782 = vperm.xlu1 %1720, %v2228_v54  }
 0x1b4   : > { %1264 = vst.msk [vmem:[%s2184_s10 + $0x18] sm:$0xff] %vm312_vm6, %v1248_v57 }
 0x1b5   : > { %1114 = vmatpush.bf16.xpose.msra.mxu1 %v1111_v52  ;;  %1636 = vmatpush.bf16.xpose.msra.mxu3 %v1111_v52  ;;  %v736_v14 = vmul.f32 1.442695, %v716_v59 }
 0x1b8   : > { %v675_v6 = vpop.xlane.xlu1 %674 }
 0x1b9   : > { %v2249_v9 = vmax.f32 %v2242_v4, %v675_v6 }
 0x1ba   : > { %v1249_v15 = vld [vmem:[#allocation2 + $0x20] sm:$0xff] }
 0x1bb   : > { %1265 = vst.msk [vmem:[%s2184_s10 + $0x20] sm:$0xff] %vm312_vm6, %v1249_v15  ;;  %v717_v17 = vsub.f32 %v2242_v4, %v2249_v9  ;;  %787 = vperm.xlu2 %1721, %v2249_v9  }
 0x1bc   : > { %1199 = vst.msk [vmem:[#allocation2 + $0x28] sm:$0xff] %vm312_vm6, %v2249_v9 }
 0x1bd   : > { %1115 = vmatpush.bf16.xpose.msra.mxu1 %v1110_v7  ;;  %1637 = vmatpush.bf16.xpose.msra.mxu3 %v1110_v7 }
 0x1c0   : > { %v677_v13 = vpop.xlane.xlu2 %676 }
 0x1c1   : > { %v2263_v23 = vmax.f32 %v2258_v21, %v677_v13 }
 0x1c3   : > { %v1250_v25 = vld [vmem:[#allocation2 + $0x28] sm:$0xff]  ;;  %1200 = vst.msk [vmem:[#allocation2 + $0x30] sm:$0xff] %vm312_vm6, %v2263_v23  ;;  %v718_v28 = vsub.f32 %v2258_v21, %v2263_v23 }
 0x1c4   : > { %1266 = vst.msk [vmem:[%s2184_s10 + $0x28] sm:$0xff] %vm312_vm6, %v1250_v25  ;;  %v660_v25 = vld [vmem:[#allocation2 + $0x60] sm:$0xff] }
 0x1c5   : > { %1116 = vmatpush.bf16.xpose.msra.mxu1 %v2136_v8  ;;  %1638 = vmatpush.bf16.xpose.msra.mxu3 %v2136_v8  ;;  %v2284_v8 = vld [vmem:[#allocation2 + $0x40] sm:$0xff] }
 0x1c8   : > { %v679_v29 = vpop.xlane.xlu1 %678 }
 0x1c9   : > { %v2274_v30 = vmax.f32 %v2271_v26, %v679_v29 }
 0x1ca   : > { %v1251_v32 = vld [vmem:[#allocation2 + $0x30] sm:$0xff] }
 0x1cb   : > { %1267 = vst.msk [vmem:[%s2184_s10 + $0x30] sm:$0xff] %vm312_vm6, %v1251_v32  ;;  %v719_v33 = vsub.f32 %v2271_v26, %v2274_v30 }
 0x1cc   : > { %1201 = vst.msk [vmem:[#allocation2 + $0x38] sm:$0xff] %vm312_vm6, %v2274_v30 }
 0x1cd   : > { %1117 = vmatpush.bf16.xpose.msra.mxu1 %v2112_v2  ;;  %1639 = vmatpush.bf16.xpose.msra.mxu3 %v2112_v2  ;;  %v657_v2 = vld [vmem:[#allocation2 + $0x48] sm:$0xff]  ;;  %v742_v24 = vmul.f32 1.442695, %v719_v33 }
 0x1d0   : > { %v681_v36 = vpop.xlane.xlu2 %680 }
 0x1d1   : > { %v2287_v38 = vmax.f32 %v2284_v8, %v681_v36 }
 0x1d3   : > { %v1252_v39 = vld [vmem:[#allocation2 + $0x38] sm:$0xff]  ;;  %v720_v41 = vsub.f32 %v2284_v8, %v2287_v38  ;;  %1202 = vst.msk [vmem:[#allocation2 + $0x40] sm:$0xff] %vm312_vm6, %v2287_v38 }
 0x1d4   : > { %1268 = vst.msk [vmem:[%s2184_s10 + $0x38] sm:$0xff] %vm312_vm6, %v1252_v39  ;;  %v732_v39 = vmul.f32 1.442695, %v714_v34  ;;  %v740_v34 = vmul.f32 1.442695, %v718_v28 }
 0x1d5   : > { %1118 = vmatpush.bf16.xpose.msra.mxu1 %v2102_v60  ;;  %1640 = vmatpush.bf16.xpose.msra.mxu3 %v2102_v60  ;;  %v744_v4 = vmul.f32 1.442695, %v720_v41 }
 0x1d6   : > { %1726 = vpow2.f32 %v732_v39  ;;  %v738_v39 = vmul.f32 1.442695, %v717_v17 }
 0x1d7   : > { %1728 = vpow2.f32 %v728_v31 }
 0x1d8   : > { %v683_v49 = vpop.xlane.xlu1 %682  ;;  %1730 = vpow2.f32 %v740_v34 }
 0x1d9   : > { %v2297_v52 = vmax.f32 %v657_v2, %v683_v49  ;;  %1732 = vpow2.f32 %v736_v14 }
 0x1da   : > { %v1253_v57 = vld [vmem:[#allocation2 + $0x40] sm:$0xff] }
 0x1db   : > { %1269 = vst.msk [vmem:[%s2184_s10 + $0x40] sm:$0xff] %vm312_vm6, %v1253_v57  ;;  %v721_v21 = vsub.f32 %v657_v2, %v2297_v52 }
 0x1dc   : > { %1203 = vst.msk [vmem:[#allocation2 + $0x48] sm:$0xff] %vm312_vm6, %v2297_v52 }
 0x1dd   : > { %1119 = vmatpush.bf16.xpose.msra.mxu1 %v2094_v55  ;;  %1641 = vmatpush.bf16.xpose.msra.mxu3 %v2094_v55  ;;  %v2317_v55 = vld [vmem:[#allocation2 + $0x58] sm:$0xff]  ;;  %v746_v16 = vmul.f32 1.442695, %v721_v21 }
 0x1df   : > { %1734 = vpow2.f32 %v746_v16 }
 0x1e0   : > { %v685_v6 = vpop.xlane.xlu2 %684 }
 0x1e1   : > { %v2308_v60 = vmax.f32 %v2305_v0, %v685_v6 }
 0x1e3   : > { %v1254_v7 = vld [vmem:[#allocation2 + $0x48] sm:$0xff]  ;;  %1204 = vst.msk [vmem:[#allocation2 + $0x50] sm:$0xff] %vm312_vm6, %v2308_v60  ;;  %812 = vperm.xlu1 %1720, %v2308_v60   ;;  %v722_v37 = vsub.f32 %v2305_v0, %v2308_v60 }
 0x1e4   : > { %1270 = vst.msk [vmem:[%s2184_s10 + $0x48] sm:$0xff] %vm312_vm6, %v1254_v7 }
 0x1e5   : > { %1120 = vmatpush.bf16.xpose.msra.mxu1 %v2086_v50  ;;  %1642 = vmatpush.bf16.xpose.msra.mxu3 %v2086_v50  ;;  %v2331_v50 = vld [vmem:[#allocation2 + $0x68] sm:$0xff]  ;;  %v748_v26 = vmul.f32 1.442695, %v722_v37 }
 0x1e8   : > { %v687_v15 = vpop.xlane.xlu1 %686 }
 0x1e9   : > { %v2320_v11 = vmax.f32 %v2317_v55, %v687_v15  ;;  %v2353_v15 = vpop.eup %1726 }
 0x1ea   : > { %v1255_v13 = vld [vmem:[#allocation2 + $0x50] sm:$0xff]  ;;  %v2364_v18 = vpop.eup %1728 }
 0x1eb   : > { %1271 = vst.msk [vmem:[%s2184_s10 + $0x50] sm:$0xff] %vm312_vm6, %v1255_v13  ;;  %817 = vperm.xlu2 %1721, %v2320_v11  }
 0x1ec   : > { %1205 = vst.msk [vmem:[#allocation2 + $0x58] sm:$0xff] %vm312_vm6, %v2320_v11 }
 0x1f0   : > { %v689_v29 = vpop.xlane.xlu2 %688 }
 0x1f1   : > { %v708_v32 = vmax.f32 %v660_v25, %v689_v29 }
 0x1f3   : > { %v1256_v36 = vld [vmem:[#allocation2 + $0x58] sm:$0xff]  ;;  %1206 = vst.msk [vmem:[#allocation2 + $0x60] sm:$0xff] %vm312_vm6, %v708_v32  ;;  %792 = vperm.xlu2 %1721, %v2263_v23   ;;  %822 = vperm.xlu1 %1720, %v708_v32   ;;  %v730_v23 = vmul.f32 1.442695, %v713_v27  ;;  %v724_v2 = vsub.f32 %v660_v25, %v708_v32 }
 0x1f4   : > { %1272 = vst.msk [vmem:[%s2184_s10 + $0x58] sm:$0xff] %vm312_vm6, %v1256_v36  ;;  %v2369_v36 = vpop.eup %1730 }
 0x1f5   : > { %1736 = vpow2.f32 %v730_v23  ;;  %v752_v27 = vmul.f32 1.442695, %v724_v2  ;;  %v2381_v25 = vpop.eup %1732 }
 0x1f6   : > { %1738 = vpow2.f32 %v734_v20 }
 0x1f7   : > { %1740 = vpow2.f32 %v742_v24 }
 0x1f8   : > { %v691_v49 = vpop.xlane.xlu1 %690  ;;  %v768_v29 = vpop.permute.xlu2 %767  ;;  %1742 = vpow2.f32 %v752_v27 }
 0x1f9   : > { %v2337_v57 = vmax.f32 %v2331_v50, %v691_v49  ;;  %v841_v47 = vsub.f32 %v2074_v44, %v768_v29  ;;  %v2384_v44 = vpop.eup %1734 }
 0x1fa   : > { %v1257_v6 = vld [vmem:[#allocation2 + $0x60] sm:$0xff] }
 0x1fb   : > { %1273 = vst.msk [vmem:[%s2184_s10 + $0x60] sm:$0xff] %vm312_vm6, %v1257_v6  ;;  %v725_v7 = vsub.f32 %v2331_v50, %v2337_v57  ;;  %837 = vperm.xlu2 %1721, %v2240_v1   ;;  %797 = vperm.xlu1 %1720, %v2274_v30   ;;  %v858_v54 = vmul.f32 1.442695, %v841_v47 }
 0x1fc   : > { %1207 = vst.msk [vmem:[#allocation2 + $0x68] sm:$0xff] %vm312_vm6, %v2337_v57  ;;  %827 = vperm.xlu0 %1722, %v2337_v57  }
 0x1fd   : > { %1744 = vpow2.f32 %v858_v54 }
 0x203   : > { %v1258_v13 = vld [vmem:[#allocation2 + $0x68] sm:$0xff]  ;;  %1013 = vperm.xlu2 %1721, %v2353_v15   ;;  %802 = vperm.xlu1 %1720, %v2287_v38  }
 0x204   : > { %1274 = vst.msk [vmem:[%s2184_s10 + $0x68] sm:$0xff] %vm312_vm6, %v1258_v13  ;;  %832 = vperm.xlu0 %1722, %v2177_v22   ;;  %s1341_s10 = scalar_lea.hbm %s2616_s3, %s1615_s30 }
 0x205   : > { %v778_v6 = vpop.permute.xlu2 %777  ;;  %s1344_s14 = sshll.u32 %s1341_s10, 4  ;;  %s1345_s14 = int_to_ptr.hbm [resolvable:$true] %s1344_s14 }
 0x206   : > { %v843_v31 = vsub.f32 %v2083_v48, %v778_v6  ;;  %v723_v48 = vsub.f32 %v2317_v55, %v2320_v11  ;;  %s1804_s22 = sshra.s32 %s1345_s14, 4  ;;  %s1805_s22 = int_to_ptr.hbm [resolvable:$true] %s1804_s22 }
 0x207   : > { %s1806_s15 = scalar_lea.hbm %s1805_s22, 128  ;;  %p1811_p4 = scmp.lt.s32.totalorder %s1805_s22, %s2616_s3 }
 0x208   : > { %v862_v9 = vmul.f32 1.442695, %v843_v31  ;;  %v750_v8 = vmul.f32 1.442695, %v723_v48  ;;  %p1807_p0 = scmp.ne.s32.totalorder %s1805_s22, %s1806_s15  ;;  %p1812_p5 = scmp.lt.s32.totalorder %s1810_s26, %s1806_s15 }
 0x20a   : > { %p1808_p1 = pnand %p1807_p0, %p1972_p3  ;;  %p1813_p6 = por %p1812_p5, %p1811_p4 }
 0x20b   : > { %1033 = vperm.xlu2 %1721, %v2369_v36   ;;  %1003 = vperm.xlu1 %1720, %v2364_v18  }
 0x20c   : > { %807 = vperm.xlu0 %1722, %v2297_v52   ;;  %v2386_v52 = vpop.eup %1736  ;;  %p1809_p2 = pneg %p1808_p1 }
 0x20d   : > { %v2393_v40 = vpop.eup %1738 }
 0x20e   : > { %p1814_p7 = pnand %p1813_p6, %p1809_p2 }
 0x210   : > { %v763_v59 = vpop.permute.xlu1 %762 }
 0x211   : > { %v840_v32 = vsub.f32 %v2067_v42, %v763_v59  ;;  %v2395_v42 = vpop.eup %1740 }
 0x212   : > { %v2397_v33 = vpop.eup %1742 }
 0x213   : > { %v856_v35 = vmul.f32 1.442695, %v840_v32  ;;  %1048 = vperm.xlu2 %1721, %v2384_v44   ;;  %1023 = vperm.xlu1 %1720, %v2381_v25   ;;  %v1745_v49 = vpop.eup %1744 }
 0x214   : > { %1008 = vperm.xlu0 %1722, %v2386_v52  }
 0x215   : > { %1746 = vpow2.f32 %v856_v35  ;;  %v773_v30 = vpop.permute.xlu0 %772  ;;  %v788_v41 = vpop.permute.xlu2 %787 }
 0x216   : > { %v842_v0 = vsub.f32 %v2080_v46, %v773_v30  ;;  %1748 = vpow2.f32 %v748_v26  ;;  %v845_v29 = vsub.f32 %v2091_v53, %v788_v41 }
 0x217   : > { %1750 = vpow2.f32 %v738_v39 }
 0x218   : > { %v860_v34 = vmul.f32 1.442695, %v842_v0  ;;  %v866_v11 = vmul.f32 1.442695, %v845_v29 }
 0x21a   : > { %1752 = vpow2.f32 %v860_v34 }
 0x21b   : > { %v1747_v28 = vpop.eup %1746  ;;  %1063 = vperm.xlu2 %1721, %v2397_v33   ;;  %1038 = vperm.xlu1 %1720, %v2395_v42   ;;  %1754 = vpow2.f32 %v744_v4 }
 0x21c   : > { %1018 = vperm.xlu0 %1722, %v2393_v40   ;;  %v1097_v60 = vpack.c.bf16 %v1745_v49, %v1747_v28  ;;  %v2410_v17 = vpop.eup %1748  ;;  %1756 = vpow2.f32 %v862_v9 }
 0x21d   : > { %v2412_v46 = vpop.eup %1750  ;;  %1758 = vpow2.f32 %v750_v8 }
 0x21e   : > { %1121 = vmatmul.bf16.vlgmr.msra.gmra.mxu1 %v1097_v60 }
 0x220   : > { %v2418_v21 = vpop.eup %1752 }
 0x221   : > { %v2420_v38 = vpop.eup %1754 }
 0x222   : > { %v1757_v14 = vpop.eup %1756 }
 0x223   : > { %1053 = vperm.xlu1 %1720, %v2410_v17   ;;  %v1098_v23 = vpack.c.bf16 %v1757_v14, %v2418_v21  ;;  %v2426_v2 = vpop.eup %1758 }
 0x224   : > { %1028 = vperm.xlu0 %1722, %v2412_v46  }
 0x225   : > { %v783_v13 = vpop.permute.xlu1 %782 }
 0x226   : > { %v844_v16 = vsub.f32 %v2088_v51, %v783_v13 }
 0x228   : > { %v864_v55 = vmul.f32 1.442695, %v844_v16 }
 0x22a   : > { %1760 = vpow2.f32 %v864_v55 }
 0x22b   : > { %1762 = vpow2.f32 %v866_v11 }
 0x22c   : > { %1043 = vperm.xlu0 %1722, %v2420_v38  }
 0x22e   : > { %1126 = vmatmul.bf16.gmra.mxu1 %v1098_v23 }
 0x230   : > { %v1761_v47 = vpop.eup %1760 }
 0x231   : > { %v2429_v20 = vpop.eup %1762 }
 0x232   : > { %v1099_v51 = vpack.c.bf16 %v2429_v20, %v1761_v47 }
 0x234   : > { %1058 = vperm.xlu0 %1722, %v2426_v2  }
 0x23e   : > { %1131 = vmatmul.bf16.gmra.mxu1 %v1099_v51 }
 0x244   : > { %920 = vadd.xlane.f32.xlu2 %v1747_v28 }
 0x245   : > { %v818_v24 = vpop.permute.xlu2 %817 }
 0x246   : > { %v851_v53 = vsub.f32 %v2126_v5, %v818_v24 }
 0x248   : > { %v878_v54 = vmul.f32 1.442695, %v851_v53 }
 0x24a   : > { %1764 = vpow2.f32 %v878_v54 }
 0x24d   : > { %v793_v27 = vpop.permute.xlu2 %792  ;;  %922 = vadd.xlane.f32.xlu1 %v1745_v49 }
 0x24e   : > { %v846_v5 = vsub.f32 %v2096_v56, %v793_v27 }
 0x250   : > { %v2435_v39 = vpop.eup %1764  ;;  %v868_v60 = vmul.f32 1.442695, %v846_v5  ;;  %v726_v5 = vsub.f32 %v2171_v19, %v2177_v22 }
 0x255   : > { %v838_v59 = vpop.permute.xlu2 %837  ;;  %928 = vadd.xlane.f32.xlu1 %v1761_v47  ;;  %v813_v32 = vpop.permute.xlu1 %812 }
 0x256   : > { %v855_v35 = vsub.f32 %v2077_v45, %v838_v59  ;;  %v850_v37 = vsub.f32 %v2115_v3, %v813_v32 }
 0x258   : > { %v886_v26 = vmul.f32 1.442695, %v855_v35  ;;  %v876_v30 = vmul.f32 1.442695, %v850_v37 }
 0x25a   : > { %1766 = vpow2.f32 %v886_v26 }
 0x25b   : > { %1768 = vpow2.f32 %v876_v30 }
 0x25c   : > { %1770 = vpow2.f32 %v868_v60  ;;  %v756_v60 = vmul.f32 1.442695, %v726_v5 }
 0x25d   : > { %v1014_v59 = vpop.permute.xlu2 %1013 }
 0x260   : > { %v1767_v6 = vpop.eup %1766 }
 0x261   : > { %v1769_v28 = vpop.eup %1768  ;;  %950 = vadd.xlane.f32.xlu2 %v1767_v6 }
 0x262   : > { %v1102_v49 = vpack.c.bf16 %v2435_v39, %v1769_v28  ;;  %v1771_v48 = vpop.eup %1770 }
 0x264   : > { %1146 = vmatmul.bf16.vlgmr.msra.gmra.mxu3 %v1102_v49 }
 0x265   : > { %v823_v0 = vpop.permute.xlu1 %822  ;;  %v2455_v37 = vpop.permute.xlu2 %1033 }
 0x266   : > { %v852_v45 = vsub.f32 %v2139_v10, %v823_v0  ;;  %v1083_v0 = vmul.f32 0.0, %v1014_v59 }
 0x268   : > { %v880_v3 = vmul.f32 1.442695, %v852_v45 }
 0x269   : > { %926 = vadd.xlane.f32.xlu2 %v1757_v14 }
 0x26a   : > { %1772 = vpow2.f32 %v880_v3 }
 0x26d   : > { %v798_v31 = vpop.permute.xlu1 %797 }
 0x26e   : > { %v828_v34 = vpop.permute.xlu0 %827  ;;  %v847_v4 = vsub.f32 %v2099_v58, %v798_v31 }
 0x26f   : > { %v853_v9 = vsub.f32 %v2152_v12, %v828_v34 }
 0x270   : > { %v870_v13 = vmul.f32 1.442695, %v847_v4  ;;  %v1773_v41 = vpop.eup %1772 }
 0x271   : > { %v882_v56 = vmul.f32 1.442695, %v853_v9  ;;  %932 = vadd.xlane.f32.xlu2 %v1771_v48 }
 0x272   : > { %1774 = vpow2.f32 %v870_v13 }
 0x273   : > { %1776 = vpow2.f32 %v882_v56 }
 0x275   : > { %v803_v14 = vpop.permute.xlu1 %802 }
 0x276   : > { %v833_v8 = vpop.permute.xlu0 %832  ;;  %v848_v58 = vsub.f32 %v2104_v61, %v803_v14 }
 0x277   : > { %v854_v10 = vsub.f32 %v2071_v43, %v833_v8 }
 0x278   : > { %v1775_v16 = vpop.eup %1774  ;;  %v872_v11 = vmul.f32 1.442695, %v848_v58 }
 0x279   : > { %v1777_v23 = vpop.eup %1776  ;;  %v884_v29 = vmul.f32 1.442695, %v854_v10  ;;  %934 = vadd.xlane.f32.xlu1 %v1775_v16  ;;  %v1100_v55 = vpack.c.bf16 %v1775_v16, %v1771_v48  ;;  %v888_v48 = vld [vmem:[#allocation3] sm:$0xff] }
 0x27a   : > { %v1103_v12 = vpack.c.bf16 %v1777_v23, %v1773_v41  ;;  %v904_v13 = vmul.f32 %v2364_v18, %v888_v48 }
 0x27b   : > { %1778 = vpow2.f32 %v884_v29  ;;  %1136 = vmatmul.bf16.gmra.mxu1 %v1100_v55 }
 0x27c   : > { %1151 = vmatmul.bf16.gmra.mxu3 %v1103_v12  ;;  %1780 = vpow2.f32 %v872_v11 }
 0x27d   : > { %v1004_v32 = vpop.permute.xlu1 %1003 }
 0x27e   : > { %v808_v47 = vpop.permute.xlu0 %807  ;;  %v1081_v35 = vmul.f32 0.0, %v1004_v32 }
 0x27f   : > { %v849_v51 = vsub.f32 %v2107_v63, %v808_v47  ;;  %v754_v63 = vmul.f32 1.442695, %v725_v7 }
 0x281   : > { %v1779_v24 = vpop.eup %1778  ;;  %v874_v27 = vmul.f32 1.442695, %v849_v51  ;;  %940 = vadd.xlane.f32.xlu1 %v1769_v28  ;;  %v2464_v28 = vpop.permute.xlu2 %1048 }
 0x282   : > { %948 = vadd.xlane.f32.xlu0 %v1779_v24  ;;  %v1781_v43 = vpop.eup %1780  ;;  %v1104_v54 = vpack.c.bf16 %v1767_v6, %v1779_v24  ;;  %v892_v24 = vld [vmem:[#allocation3 + $0x20] sm:$0xff] }
 0x283   : > { %1782 = vpow2.f32 %v874_v27  ;;  %v908_v27 = vmul.f32 %v2381_v25, %v892_v24 }
 0x284   : > { %1784 = vpow2.f32 %v754_v63 }
 0x286   : > { %v1009_v57 = vpop.permute.xlu0 %1008 }
 0x289   : > { %v1783_v53 = vpop.eup %1782  ;;  %946 = vadd.xlane.f32.xlu1 %v1777_v23  ;;  %v2472_v31 = vpop.permute.xlu2 %1063  ;;  %v889_v23 = vld [vmem:[#allocation3 + $0x8] sm:$0xff] }
 0x28a   : > { %924 = vadd.xlane.f32.xlu0 %v2418_v21  ;;  %938 = vadd.xlane.f32.xlu2 %v1783_v53  ;;  %v1101_v61 = vpack.c.bf16 %v1783_v53, %v1781_v43  ;;  %v727_v21 = vsub.f32 %v2237_v62, %v2240_v1  ;;  %v2460_v7 = vpop.eup %1784  ;;  %v1024_v1 = vpop.permute.xlu1 %1023  ;;  %v905_v18 = vmul.f32 %v2386_v52, %v889_v23  ;;  %v903_v52 = vld [vmem:[#allocation3 + $0x78] sm:$0xff]  ;;  %v1093_v24 = vmul.f32 0.0, %v2472_v31  ;;  %v893_v31 = vld [vmem:[#allocation3 + $0x28] sm:$0xff] }
 0x28b   : > { %v1085_v10 = vmul.f32 0.0, %v1024_v1 }
 0x28c   : > { %1141 = vmatmul.bf16.gmra.mxu1 %v1101_v61  ;;  %1156 = vmatmul.bf16.gmra.mxu3 %v1104_v54  ;;  %v758_v50 = vmul.f32 1.442695, %v727_v21 }
 0x28e   : > { %1786 = vpow2.f32 %v758_v50  ;;  %v1019_v34 = vpop.permute.xlu0 %1018  ;;  %v894_v50 = vld [vmem:[#allocation3 + $0x30] sm:$0xff] }
 0x28f   : > { %1788 = vpow2.f32 %v756_v60  ;;  %v1084_v4 = vmul.f32 0.0, %v1019_v34 }
 0x292   : > { %930 = vadd.xlane.f32.xlu0 %v2429_v20  ;;  %944 = vadd.xlane.f32.xlu2 %v1773_v41  ;;  %v1082_v20 = vmul.f32 0.0, %v1009_v57  ;;  %v2469_v3 = vpop.permute.xlu1 %1038 }
 0x294   : > { %v1787_v49 = vpop.eup %1786 }
 0x295   : > { %v2474_v22 = vpop.eup %1788  ;;  %v919_v59 = vmul.f32 %v1787_v49, %v903_v52 }
 0x296   : > { %v1029_v29 = vpop.permute.xlu0 %1028 }
 0x297   : > { %v1086_v11 = vmul.f32 0.0, %v1029_v29 }
 0x29a   : > { %936 = vadd.xlane.f32.xlu0 %v1781_v43  ;;  %v1054_v8 = vpop.permute.xlu1 %1053 }
 0x29b   : > { %v1122_v26 = vpop.f32.mrf.mxu1 }
 0x29c   : > { %v1162_v30 = vadd.f32 %v1122_v26, %v1081_v35  ;;  %v891_v35 = vld [vmem:[#allocation3 + $0x18] sm:$0xff] }
 0x29d   : > { %v907_v25 = vmul.f32 %v2393_v40, %v891_v35 }
 0x29e   : > { %1229 = vst [vmem:[%s2457_s13] sm:$0xff] %v1162_v30  ;;  %v2504_v57 = vpop.permute.xlu0 %1043 }
 0x2a2   : > { %942 = vadd.xlane.f32.xlu0 %v2435_v39  ;;  %1068 = vperm.xlu1 %1720, %v2460_v7  }
 0x2a3   : > { %v1124_v62 = vpop.f32.mrf.mxu1 }
 0x2a4   : > { %v1163_v6 = vadd.f32 %v1124_v62, %v1082_v20  ;;  %v910_v20 = vmul.f32 %v2369_v36, %v894_v50  ;;  %v1089_v50 = vmul.f32 0.0, %v2504_v57 }
 0x2a6   : > { %1230 = vst [vmem:[%s2457_s13 + $0x8] sm:$0xff] %v1163_v6  ;;  %v1091_v6 = vmul.f32 0.0, %v1054_v8  ;;  %v1059_v60 = vpop.permute.xlu0 %1058 }
 0x2a7   : > { %v1092_v36 = vmul.f32 0.0, %v1059_v60 }
 0x2aa   : > { %1078 = vperm.xlu2 %1721, %v1787_v49  }
 0x2ab   : > { %v1127_v45 = vpop.f32.mrf.mxu1 }
 0x2ac   : > { %v1164_v39 = vadd.f32 %v1127_v45, %v1083_v0  ;;  %v895_v0 = vld [vmem:[#allocation3 + $0x38] sm:$0xff] }
 0x2ad   : > { %v911_v45 = vmul.f32 %v2395_v42, %v895_v0  ;;  %v1090_v0 = vmul.f32 0.0, %v2464_v28 }
 0x2ae   : > { %1231 = vst [vmem:[%s2457_s13 + $0x10] sm:$0xff] %v1164_v39 }
 0x2b3   : > { %v1129_v9 = vpop.f32.mrf.mxu1 }
 0x2b4   : > { %v1165_v19 = vadd.f32 %v1129_v9, %v1084_v4 }
 0x2b6   : > { %1232 = vst [vmem:[%s2457_s13 + $0x18] sm:$0xff] %v1165_v19  ;;  %1073 = vperm.xlu0 %1722, %v2474_v22   ;;  %v898_v19 = vld [vmem:[#allocation3 + $0x50] sm:$0xff] }
 0x2b7   : > { %v921_v56 = vpop.xlane.xlu2 %920 }
 0x2b8   : > { %v952_v41 = vadd.f32 %v921_v56, %v904_v13  ;;  %v902_v13 = vld [vmem:[#allocation3 + $0x70] sm:$0xff]  ;;  %v914_v56 = vmul.f32 %v2410_v17, %v898_v19 }
 0x2b9   : > { %v918_v8 = vmul.f32 %v2474_v22, %v902_v13  ;;  %v890_v17 = vld [vmem:[#allocation3 + $0x10] sm:$0xff] }
 0x2ba   : > { %969 = vst.msk [vmem:[#allocation3] sm:$0xff] %vm312_vm6, %v952_v41  ;;  %v906_v22 = vmul.f32 %v2353_v15, %v890_v17 }
 0x2bb   : > { %v1132_v14 = vpop.f32.mrf.mxu1 }
 0x2bc   : > { %v1166_v16 = vadd.f32 %v1132_v14, %v1085_v10 }
 0x2be   : > { %1233 = vst [vmem:[%s2457_s13 + $0x20] sm:$0xff] %v1166_v16  ;;  %v1087_v16 = vmul.f32 0.0, %v2455_v37 }
 0x2c0   : > { %v923_v55 = vpop.xlane.xlu1 %922 }
 0x2c1   : > { %v1277_v58 = vld [vmem:[#allocation3] sm:$0xff]  ;;  %v953_v12 = vadd.f32 %v923_v55, %v905_v18  ;;  %v897_v55 = vld [vmem:[#allocation3 + $0x48] sm:$0xff] }
 0x2c2   : > { %1293 = vst.msk [vmem:[%s2486_s17] sm:$0xff] %vm312_vm6, %v1277_v58  ;;  %v901_v58 = vld [vmem:[#allocation3 + $0x68] sm:$0xff] }
 0x2c3   : > { %970 = vst.msk [vmem:[#allocation3 + $0x8] sm:$0xff] %vm312_vm6, %v953_v12  ;;  %v1134_v47 = vpop.f32.mrf.mxu1  ;;  %v913_v12 = vmul.f32 %v2384_v44, %v897_v55 }
 0x2c4   : > { %v1167_v51 = vadd.f32 %v1134_v47, %v1086_v11 }
 0x2c6   : > { %1234 = vst [vmem:[%s2457_s13 + $0x28] sm:$0xff] %v1167_v51  ;;  %v917_v51 = vmul.f32 %v2460_v7, %v901_v58 }
 0x2c8   : > { %v929_v43 = vpop.xlane.xlu1 %928 }
 0x2c9   : > { %v956_v53 = vadd.f32 %v929_v43, %v908_v27 }
 0x2ca   : > { %v1278_v61 = vld [vmem:[#allocation3 + $0x8] sm:$0xff] }
 0x2cb   : > { %1294 = vst.msk [vmem:[%s2486_s17 + $0x8] sm:$0xff] %vm312_vm6, %v1278_v61  ;;  %v1088_v61 = vmul.f32 0.0, %v2469_v3  ;;  %v900_v3 = vld [vmem:[#allocation3 + $0x60] sm:$0xff] }
 0x2cc   : > { %973 = vst.msk [vmem:[#allocation3 + $0x20] sm:$0xff] %vm312_vm6, %v956_v53 }
 0x2d3   : > { %v1281_v54 = vld [vmem:[#allocation3 + $0x20] sm:$0xff] }
 0x2d4   : > { %1297 = vst.msk [vmem:[%s2486_s17 + $0x20] sm:$0xff] %vm312_vm6, %v1281_v54  ;;  %v951_v63 = vpop.xlane.xlu2 %950 }
 0x2d5   : > { %v967_v32 = vadd.f32 %v951_v63, %v919_v59  ;;  %v909_v63 = vmul.f32 %v2412_v46, %v893_v31 }
 0x2d7   : > { %984 = vst.msk [vmem:[#allocation3 + $0x78] sm:$0xff] %vm312_vm6, %v967_v32 }
 0x2dc   : > { %v927_v21 = vpop.xlane.xlu2 %926 }
 0x2dd   : > { %v955_v26 = vadd.f32 %v927_v21, %v907_v25  ;;  %v916_v21 = vmul.f32 %v2397_v33, %v900_v3 }
 0x2de   : > { %v1292_v30 = vld [vmem:[#allocation3 + $0x78] sm:$0xff] }
 0x2df   : > { %1308 = vst.msk [vmem:[%s2486_s17 + $0x78] sm:$0xff] %vm312_vm6, %v1292_v30 }
 0x2e0   : > { %972 = vst.msk [vmem:[#allocation3 + $0x18] sm:$0xff] %vm312_vm6, %v955_v26 }
 0x2e4   : > { %v933_v62 = vpop.xlane.xlu2 %932 }
 0x2e5   : > { %v958_v1 = vadd.f32 %v933_v62, %v910_v20 }
 0x2e7   : > { %v1280_v5 = vld [vmem:[#allocation3 + $0x18] sm:$0xff]  ;;  %975 = vst.msk [vmem:[#allocation3 + $0x30] sm:$0xff] %vm312_vm6, %v958_v1  ;;  %v1147_v40 = vpop.f32.mrf.mxu3  ;;  %v896_v1 = vld [vmem:[#allocation3 + $0x40] sm:$0xff] }
 0x2e8   : > { %1296 = vst.msk [vmem:[%s2486_s17 + $0x18] sm:$0xff] %vm312_vm6, %v1280_v5  ;;  %v1172_v49 = vadd.f32 %v1147_v40, %v1091_v6  ;;  %v912_v33 = vmul.f32 %v2420_v38, %v896_v1 }
 0x2ea   : > { %1239 = vst [vmem:[%s2457_s13 + $0x50] sm:$0xff] %v1172_v49 }
 0x2ec   : > { %v935_v39 = vpop.xlane.xlu1 %934 }
 0x2ed   : > { %v959_v34 = vadd.f32 %v935_v39, %v911_v45  ;;  %v899_v39 = vld [vmem:[#allocation3 + $0x58] sm:$0xff] }
 0x2ee   : > { %v1283_v4 = vld [vmem:[#allocation3 + $0x30] sm:$0xff]  ;;  %v915_v38 = vmul.f32 %v2426_v2, %v899_v39 }
 0x2ef   : > { %1299 = vst.msk [vmem:[%s2486_s17 + $0x30] sm:$0xff] %vm312_vm6, %v1283_v4  ;;  %v1149_v9 = vpop.f32.mrf.mxu3 }
 0x2f0   : > { %976 = vst.msk [vmem:[#allocation3 + $0x38] sm:$0xff] %vm312_vm6, %v959_v34  ;;  %v1173_v48 = vadd.f32 %v1149_v9, %v1092_v36 }
 0x2f2   : > { %1240 = vst [vmem:[%s2457_s13 + $0x58] sm:$0xff] %v1173_v48 }
 0x2f4   : > { %v941_v42 = vpop.xlane.xlu1 %940 }
 0x2f5   : > { %v949_v41 = vpop.xlane.xlu0 %948  ;;  %v962_v10 = vadd.f32 %v941_v42, %v914_v56 }
 0x2f6   : > { %v966_v14 = vadd.f32 %v949_v41, %v918_v8 }
 0x2f7   : > { %v1284_v23 = vld [vmem:[#allocation3 + $0x38] sm:$0xff]  ;;  %979 = vst.msk [vmem:[#allocation3 + $0x50] sm:$0xff] %vm312_vm6, %v962_v10 }
 0x2f8   : > { %1300 = vst.msk [vmem:[%s2486_s17 + $0x38] sm:$0xff] %vm312_vm6, %v1284_v23  ;;  %v1137_v29 = vpop.f32.mrf.mxu1 }
 0x2f9   : > { %983 = vst.msk [vmem:[#allocation3 + $0x70] sm:$0xff] %vm312_vm6, %v966_v14  ;;  %v1168_v18 = vadd.f32 %v1137_v29, %v1087_v16 }
 0x2fb   : > { %1235 = vst [vmem:[%s2457_s13 + $0x30] sm:$0xff] %v1168_v18 }
 0x2fc   : > { %v947_v11 = vpop.xlane.xlu1 %946 }
 0x2fd   : > { %v925_v37 = vpop.xlane.xlu0 %924  ;;  %v939_v47 = vpop.xlane.xlu2 %938  ;;  %v965_v15 = vadd.f32 %v947_v11, %v917_v51 }
 0x2fe   : > { %v1287_v27 = vld [vmem:[#allocation3 + $0x50] sm:$0xff]  ;;  %v954_v43 = vadd.f32 %v925_v37, %v906_v22  ;;  %v961_v53 = vadd.f32 %v939_v47, %v913_v12 }
 0x2ff   : > { %1303 = vst.msk [vmem:[%s2486_s17 + $0x50] sm:$0xff] %vm312_vm6, %v1287_v27  ;;  %v1152_v52 = vpop.f32.mrf.mxu3 }
 0x300   : > { %v1291_v44 = vld [vmem:[#allocation3 + $0x70] sm:$0xff]  ;;  %971 = vst.msk [vmem:[#allocation3 + $0x10] sm:$0xff] %vm312_vm6, %v954_v43  ;;  %v1174_v54 = vadd.f32 %v1152_v52, %v1093_v24  ;;  %v1139_v59 = vpop.f32.mrf.mxu1 }
 0x301   : > { %1307 = vst.msk [vmem:[%s2486_s17 + $0x70] sm:$0xff] %vm312_vm6, %v1291_v44  ;;  %v1169_v7 = vadd.f32 %v1139_v59, %v1088_v61 }
 0x302   : > { %978 = vst.msk [vmem:[#allocation3 + $0x48] sm:$0xff] %vm312_vm6, %v961_v53 }
 0x303   : > { %982 = vst.msk [vmem:[#allocation3 + $0x68] sm:$0xff] %vm312_vm6, %v965_v15 }
 0x304   : > { %1241 = vst [vmem:[%s2457_s13 + $0x60] sm:$0xff] %v1174_v54 }
 0x305   : > { %1236 = vst [vmem:[%s2457_s13 + $0x38] sm:$0xff] %v1169_v7  ;;  %v931_v32 = vpop.xlane.xlu0 %930  ;;  %v945_v35 = vpop.xlane.xlu2 %944 }
 0x306   : > { %v957_v25 = vadd.f32 %v931_v32, %v909_v63  ;;  %v964_v20 = vadd.f32 %v945_v35, %v916_v21 }
 0x307   : > { %v1279_v26 = vld [vmem:[#allocation3 + $0x10] sm:$0xff]  ;;  %v1154_v30 = vpop.f32.mrf.mxu3 }
 0x308   : > { %1295 = vst.msk [vmem:[%s2486_s17 + $0x10] sm:$0xff] %vm312_vm6, %v1279_v26 }
 0x309   : > { %v1286_v62 = vld [vmem:[#allocation3 + $0x48] sm:$0xff]  ;;  %974 = vst.msk [vmem:[#allocation3 + $0x28] sm:$0xff] %vm312_vm6, %v957_v25  ;;  %v1142_v46 = vpop.f32.mrf.mxu1 }
 0x30a   : > { %1302 = vst.msk [vmem:[%s2486_s17 + $0x48] sm:$0xff] %vm312_vm6, %v1286_v62  ;;  %v1290_v6 = vld [vmem:[#allocation3 + $0x68] sm:$0xff]  ;;  %v1170_v5 = vadd.f32 %v1142_v46, %v1089_v50 }
 0x30b   : > { %1306 = vst.msk [vmem:[%s2486_s17 + $0x68] sm:$0xff] %vm312_vm6, %v1290_v6 }
 0x30c   : > { %981 = vst.msk [vmem:[#allocation3 + $0x60] sm:$0xff] %vm312_vm6, %v964_v20 }
 0x30d   : > { %1237 = vst [vmem:[%s2457_s13 + $0x40] sm:$0xff] %v1170_v5  ;;  %v937_v57 = vpop.xlane.xlu0 %936  ;;  %v1079_v4 = vpop.permute.xlu2 %1078 }
 0x30e   : > { %v960_v40 = vadd.f32 %v937_v57, %v912_v33  ;;  %v1096_v19 = vmul.f32 0.0, %v1079_v4 }
 0x30f   : > { %v1157_v49 = vpop.f32.mrf.mxu3 }
 0x310   : > { %v1282_v60 = vld [vmem:[#allocation3 + $0x28] sm:$0xff]  ;;  %977 = vst.msk [vmem:[#allocation3 + $0x40] sm:$0xff] %vm312_vm6, %v960_v40 }
 0x311   : > { %1298 = vst.msk [vmem:[%s2486_s17 + $0x28] sm:$0xff] %vm312_vm6, %v1282_v60  ;;  %v1144_v45 = vpop.f32.mrf.mxu1 }
 0x312   : > { %v1171_v34 = vadd.f32 %v1144_v45, %v1090_v0 }
 0x313   : > { %v1289_v36 = vld [vmem:[#allocation3 + $0x60] sm:$0xff] }
 0x314   : > { %1305 = vst.msk [vmem:[%s2486_s17 + $0x60] sm:$0xff] %vm312_vm6, %v1289_v36  ;;  %v1069_v28 = vpop.permute.xlu1 %1068 }
 0x315   : > { %1238 = vst [vmem:[%s2457_s13 + $0x48] sm:$0xff] %v1171_v34  ;;  %v943_v9 = vpop.xlane.xlu0 %942  ;;  %v1094_v48 = vmul.f32 0.0, %v1069_v28 }
 0x316   : > { %v963_v13 = vadd.f32 %v943_v9, %v915_v38 }
 0x317   : > { %v1285_v56 = vld [vmem:[#allocation3 + $0x40] sm:$0xff]  ;;  %v1175_v8 = vadd.f32 %v1154_v30, %v1094_v48  ;;  %v1159_v42 = vpop.f32.mrf.mxu3 }
 0x318   : > { %1301 = vst.msk [vmem:[%s2486_s17 + $0x40] sm:$0xff] %vm312_vm6, %v1285_v56  ;;  %v1177_v41 = vadd.f32 %v1159_v42, %v1096_v19 }
 0x319   : > { %980 = vst.msk [vmem:[#allocation3 + $0x58] sm:$0xff] %vm312_vm6, %v963_v13 }
 0x31a   : > { %1242 = vst [vmem:[%s2457_s13 + $0x68] sm:$0xff] %v1175_v8 }
 0x31b   : > { %1244 = vst [vmem:[%s2457_s13 + $0x78] sm:$0xff] %v1177_v41 }
 0x320   : > { %v1288_v2 = vld [vmem:[#allocation3 + $0x58] sm:$0xff] }
 0x321   : > { %1304 = vst.msk [vmem:[%s2486_s17 + $0x58] sm:$0xff] %vm312_vm6, %v1288_v2 }
 0x328   : > { %v1074_v10 = vpop.permute.xlu0 %1073 }
 0x329   : > { %v1095_v14 = vmul.f32 0.0, %v1074_v10 }
 0x32b   : > { %v1176_v16 = vadd.f32 %v1157_v49, %v1095_v14 }
 0x32d   : > { %1243 = vst [vmem:[%s2457_s13 + $0x70] sm:$0xff] %v1176_v16 }
 0x32e   : > { %1817 = shalt.err (!%p1814_p7)
}
 0x32f   : > { %s1889_s29 = smov 128   ;;  %s1890_s13 = smov 8  }
 0x330   : > { %1643 = dma.vmem_to_hbm [thread:$0]  (%p1972_p3), %s1343_s12, 2048, %s1345_s14, %s1310_s21, %s1889_s29, %s1889_s29, %s1890_s13  }
 0x331 PF: > { %p1649_p9 = scmp.ge.s32.totalorder %s1884_s25, 2  ;;  %s1365_s8 = sand.u32 1, %s1856_s18  }
 0x332   : > { %s1366_s9 = scalar_lea.sflag [#allocation6], %s1365_s8 }
 0x333   : > { %p1646_p10 = pnand %p1649_p9, %p1981_p8 }
 0x335   : > { %p1647_p11 = pneg %p1646_p10 }
 0x337   : > { %1851 = dma.done.wait (%p1647_p11), %s1366_s9, 2048  }
 0x338   : > { %1853 = vsyncadd (%p1647_p11), %s1366_s9, 4294965248  ;;  %s19_s25 = sadd.s32 1, %s1884_s25   ;;  %s2623_s6 = sld [smem:[#allocation8_spill]] }
 0x339   : > { %p16_p12 = scmp.ge.s32.totalorder %s19_s25, 6   ;;  %s2624_s18 = smov %s1860_s19 }
 0x33a   : > { %s2625_s19 = smov %s1864_s20  ;;  %s2626_s20 = smov %s1990_s11 }
 0x33b   : > { %s2627_s21 = smov %s1876_s23  ;;  %s2628_s22 = smov %s1880_s24 }
 0x33c   : > { %s2629_s23 = smov %s2632_s28  ;;  %18 = sbr.rel (!%p16_p12) target bundleno = 5 (0x5), region = 99 }
 0x33e   : > { %s2630_s24 = smov %s2623_s6 }
 0x341   :  { %1396 = vsyncpa [#allocation6], 1 }
 0x342   :  { %1398 = vsyncpa [#allocation6 + $0x1], 1 }

</bundles_post_ra>
